<compile_context>
chip_gen: v7x
topology: tpu7x:2x2x1
jax: 0.10.0
libtpu: 0.0.40
codegen_flags: <defaults>
</compile_context>

<pallas_src>
import functools

import numpy as np
import jax
import jax.numpy as jnp
from jax.experimental import pallas as pl
from jax.experimental.pallas import tpu as pltpu

EPS = 1e-5
NEG_SLOPE = 0.01  # nn.LeakyReLU default


# ------------------------------ Pallas kernel ------------------------------ #
def _fused_conv_block_kernel(x_ref, w1_ref, b1_ref, w2_ref, b2_ref, o_ref,
                             y1_ref, y2_ref):
    """Fused (conv3x3 + BN + LeakyReLU) x 2 for one (batch, row-tile) grid cell.

    x_ref : (NX, Wp, Cin)    reflect-padded NHWC input rows for this tile
                             (NX = NY + 2 rows incl. halo, Wp = W + 2 cols)
    w1_ref: (9, Cin, Cout)   conv1 weights, tap-major, BN1 scale folded in
    b1_ref: (1, Cout)        folded BN1 bias
    w2_ref: (9, Cout, Cout)  conv2 weights, tap-major, BN2 scale folded in
    b2_ref: (1, Cout)        folded BN2 bias
    o_ref : (TR*W, Cout)     output tile (rows r0..r0+TR-1, NHWC order flattened)
    y1_ref: (NY, Wp, Cout)   scratch: stage-1 output rows [ystart, ystart+NY),
                             reflect-padded along W
    y2_ref: (TR+2, Wp, Cout) scratch: stage-2 input (reflect-padded rows)
    """
    NX, Wp, Cin = x_ref.shape
    NY = NX - 2
    W = Wp - 2
    Cout = o_ref.shape[1]
    TR = o_ref.shape[0] // W

    # ------------- stage 1: conv1 (+ folded BN scale) + bias + LeakyReLU ----
    acc1 = jnp.zeros((NY * W, Cout), jnp.float32)
    for dy in range(3):
        for dx in range(3):
            patch = x_ref[dy:dy + NY, dx:dx + W, :].reshape(NY * W, Cin)
            acc1 = acc1 + jnp.dot(patch, w1_ref[3 * dy + dx],
                                  preferred_element_type=jnp.float32)
    y1 = acc1 + b1_ref[...]                                   # f32 epilogue
    y1 = jnp.where(y1 > 0, y1, NEG_SLOPE * y1)
    y1 = y1.astype(y1_ref.dtype).reshape(NY, W, Cout)
    # store into scratch with reflect padding along W (pad=1)
    y1_ref[:, 1:W + 1, :] = y1
    y1_ref[:, 0:1, :] = y1[:, 1:2, :]
    y1_ref[:, W + 1:W + 2, :] = y1[:, W - 2:W - 1, :]

    # -------- stage-2 input rows: reflect-padded rows r0-1 .. r0+TR of y1 ----
    # y1_ref holds stage-1 rows [ystart, ystart+NY); pick the TR+2 rows the second
    # conv needs, applying reflect padding at the image top / bottom.
    t = pl.program_id(1)
    H = pl.num_programs(1) * TR
    r0 = t * TR
    ystart = jnp.clip(r0 - 1, 0, H - NY)                        # first row in y1_ref
    top = jnp.where(r0 == 0, 1, r0 - 1) - ystart                # reflect(r0 - 1)
    mid = r0 - ystart
    bot = jnp.where(r0 + TR >= H, H - 2, r0 + TR) - ystart      # reflect(r0 + TR)
    y2_ref[0:1] = y1_ref[pl.ds(top, 1)]
    y2_ref[1:TR + 1] = y1_ref[pl.ds(mid, TR)]
    y2_ref[TR + 1:TR + 2] = y1_ref[pl.ds(bot, 1)]

    # ------------- stage 2: conv2 (+ folded BN scale) + bias + LeakyReLU ----
    acc2 = jnp.zeros((TR * W, Cout), jnp.float32)
    for dy in range(3):
        for dx in range(3):
            patch = y2_ref[dy:dy + TR, dx:dx + W, :].reshape(TR * W, Cout)
            acc2 = acc2 + jnp.dot(patch, w2_ref[3 * dy + dx],
                                  preferred_element_type=jnp.float32)
    y2 = acc2 + b2_ref[...]                                    # f32 epilogue
    y2 = jnp.where(y2 > 0, y2, NEG_SLOPE * y2)
    o_ref[...] = y2.astype(o_ref.dtype)


# --------------------------------- wrapper --------------------------------- #
def _fold_bn_into_conv(w_oihw, gamma, beta, mean, var, compute_dtype):
    """Fold eval-mode BatchNorm into the conv: (9, Cin, Cout) weights + (1, Cout) bias."""
    scale = gamma / jnp.sqrt(var + EPS)                         # (Cout,)
    bias = (beta - mean * scale).reshape(1, -1).astype(jnp.float32)
    cout, cin = w_oihw.shape[0], w_oihw.shape[1]
    w_tap = jnp.transpose(w_oihw, (2, 3, 1, 0)).reshape(9, cin, cout)  # tap-major
    w_tap = (w_tap * scale[None, None, :]).astype(compute_dtype)
    return w_tap, bias


def _pick_row_tile(h, w, max_tile_elems=64 * 128):
    """Largest divisor of H whose per-tile working set stays small (VMEM-friendly
    even on v7x) while keeping the output block sublane-aligned."""
    cands = [tr for tr in range(1, h + 1)
             if h % tr == 0 and (h // tr == 1 or (tr * w) % 8 == 0)]
    small = [tr for tr in cands if tr * w <= max_tile_elems]
    return max(small) if small else min(cands)


@functools.partial(jax.jit, static_argnames=("row_tile", "compute_dtype"))
def conv_block_forward(x_nchw, params, row_tile=None, compute_dtype=jnp.float32):
    """Pallas implementation of Conv_Block.forward (eval mode). NCHW in / NCHW out."""
    N, Cin, H, W = x_nchw.shape
    Cout = params["w1"].shape[0]
    if H < 2 or W < 2:
        raise ValueError("reflect padding (pad=1) requires H >= 2 and W >= 2")
    TR = _pick_row_tile(H, W) if row_tile is None else int(row_tile)
    if H % TR != 0:
        raise ValueError(f"row_tile={TR} must divide H={H}")
    nt = H // TR
    if nt > 1 and (TR * W) % 8 != 0:
        raise ValueError("row_tile*W must be a multiple of 8 when tiling")
    NY = min(TR + 2, H)       # stage-1 rows computed per tile (incl. stage-2 halo)
    NX = NY + 2               # reflect-padded input rows needed per tile
    Wp = W + 2

    # Fold BatchNorm (running stats) into conv weights / per-channel bias.
    w1, b1 = _fold_bn_into_conv(params["w1"], params["gamma1"], params["beta1"],
                                params["mean1"], params["var1"], compute_dtype)
    w2, b2 = _fold_bn_into_conv(params["w2"], params["gamma2"], params["beta2"],
                                params["mean2"], params["var2"], compute_dtype)

    # NCHW -> NHWC, reflect-pad W, and gather per-tile row slabs.  The row gather
    # implements the reflect padding along H *and* the 2-row stage-2 halo; this
    # few-rows duplication replaces the old 9x HBM im2col expansion.
    x_nhwc = jnp.transpose(x_nchw, (0, 2, 3, 1))                      # (N, H, W, Cin)
    x_wpad = jnp.pad(x_nhwc, ((0, 0), (0, 0), (1, 1), (0, 0)), mode="reflect")

    def _src_row(p):  # source row of H-padded (reflect, pad=1) row index p
        return 1 if p == 0 else (H - 2 if p == H + 1 else p - 1)

    rows = np.empty((nt, NX), np.int32)
    for t in range(nt):
        ystart = int(np.clip(t * TR - 1, 0, H - NY))
        rows[t] = [_src_row(ystart + j) for j in range(NX)]
    x_slab = x_wpad[:, rows, :, :].astype(compute_dtype)              # (N, nt, NX, Wp, Cin)

    flops = 2 * N * H * W * 9 * (Cin * Cout + Cout * Cout)
    bytes_accessed = (x_slab.size * x_slab.dtype.itemsize
                      + w1.size * w1.dtype.itemsize + w2.size * w2.dtype.itemsize
                      + N * H * W * Cout * x_nchw.dtype.itemsize)

    out = pl.pallas_call(
        _fused_conv_block_kernel,
        out_shape=jax.ShapeDtypeStruct((N, H * W, Cout), x_nchw.dtype),
        grid_spec=pltpu.PrefetchScalarGridSpec(
            num_scalar_prefetch=0,
            grid=(N, nt),
            in_specs=[
                pl.BlockSpec((None, None, NX, Wp, Cin), lambda n, t: (n, t, 0, 0, 0)),
                pl.BlockSpec((9, Cin, Cout), lambda n, t: (0, 0, 0)),
                pl.BlockSpec((1, Cout), lambda n, t: (0, 0)),
                pl.BlockSpec((9, Cout, Cout), lambda n, t: (0, 0, 0)),
                pl.BlockSpec((1, Cout), lambda n, t: (0, 0)),
            ],
            out_specs=pl.BlockSpec((None, TR * W, Cout), lambda n, t: (n, t, 0)),
            scratch_shapes=[
                pltpu.VMEM((NY, Wp, Cout), compute_dtype),      # stage-1 output (+W pad)
                pltpu.VMEM((TR + 2, Wp, Cout), compute_dtype),  # stage-2 input rows
            ],
        ),
        compiler_params=pltpu.CompilerParams(
            dimension_semantics=("parallel", "parallel"),   # megacore / v7x dual-TC
            vmem_limit_bytes=32 * 1024 * 1024,              # small tiles; safe on v5e-v7x
        ),
        cost_estimate=pl.CostEstimate(flops=flops, transcendentals=0,
                                      bytes_accessed=bytes_accessed),
    )(x_slab, w1, b1, w2, b2)

    # (N, H*W, Cout) -> NCHW
    return jnp.transpose(out.reshape(N, H, W, Cout), (0, 3, 1, 2))


# --------------------------- params / reference ----------------------------- #
def init_params(key, in_channel, out_channel):
    keys = jax.random.split(key, 8)
    p = {}
    p["w1"] = 0.1 * jax.random.normal(keys[0], (out_channel, in_channel, 3, 3), jnp.float32)
    p["w2"] = 0.1 * jax.random.normal(keys[1], (out_channel, out_channel, 3, 3), jnp.float32)
    for i, (kg, km, kv) in zip((1, 2), ((keys[2], keys[3], keys[4]),
                                        (keys[5], keys[6], keys[7]))):
        p[f"gamma{i}"] = 1.0 + 0.1 * jax.random.normal(kg, (out_channel,), jnp.float32)
        p[f"beta{i}"] = 0.05 * jnp.arange(out_channel, dtype=jnp.float32)
        p[f"mean{i}"] = 0.1 * jax.random.normal(km, (out_channel,), jnp.float32)
        p[f"var{i}"] = 1.0 + 0.3 * jax.random.uniform(kv, (out_channel,), jnp.float32)
    return p


def reference_forward(x_nchw, params):
    """Pure-JAX (XLA) reference with identical eval-mode semantics."""
    def stage(x, w, gamma, beta, mean, var):
        xp = jnp.pad(x, ((0, 0), (0, 0), (1, 1), (1, 1)), mode="reflect")
        y = jax.lax.conv_general_dilated(
            xp, w, (1, 1), "VALID",
            dimension_numbers=("NCHW", "OIHW", "NCHW"),
            precision=jax.lax.Precision.HIGHEST)
        s = gamma / jnp.sqrt(var + EPS)
        b = beta - mean * s
        y = y * s[None, :, None, None] + b[None, :, None, None]
        return jnp.where(y > 0, y, NEG_SLOPE * y)

    x = stage(x_nchw, params["w1"], params["gamma1"], params["beta1"],
              params["mean1"], params["var1"])
    x = stage(x, params["w2"], params["gamma2"], params["beta2"],
              params["mean2"], params["var2"])
    return x


if __name__ == "__main__":
    in_channel, out_channel = 4, 8
    N, H, W = 2, 16, 16
    key = jax.random.PRNGKey(0)
    kx, kp = jax.random.split(key)
    x = jax.random.normal(kx, (N, in_channel, H, W), jnp.float32)   # NCHW
    params = init_params(kp, in_channel, out_channel)

    ref = jax.block_until_ready(reference_forward(x, params))

    # f32 MXU path (exact eval-mode semantics, tight tolerance)
    out_f32 = jax.block_until_ready(
        conv_block_forward(x, params, row_tile=8, compute_dtype=jnp.float32))
    assert out_f32.shape == (N, out_channel, H, W), out_f32.shape
    assert jnp.allclose(out_f32, ref, atol=2e-3, rtol=2e-3), \
        float(jnp.max(jnp.abs(out_f32 - ref)))

    # bf16 matmul inputs (f32 accumulation / epilogue) -- v6e/v7x fast path
    out_bf16 = jax.block_until_ready(
        conv_block_forward(x, params, row_tile=8, compute_dtype=jnp.bfloat16))
    assert out_bf16.shape == (N, out_channel, H, W), out_bf16.shape
    assert jnp.allclose(out_bf16, ref, atol=5e-2, rtol=5e-2), \
        float(jnp.max(jnp.abs(out_bf16 - ref)))

    print("KERNEL_OK")
</pallas_src>

<mosaic_0001>
module attributes {stable_mosaic.version = 11 : i64} {
  func.func @_fused_conv_block_kernel(%arg0: i32, %arg1: i32, %arg2: memref<1x1x12x18x4xf32, #tpu.memory_space<vmem>>, %arg3: memref<9x4x8xf32, #tpu.memory_space<vmem>>, %arg4: memref<1x8xf32, #tpu.memory_space<vmem>>, %arg5: memref<9x8x8xf32, #tpu.memory_space<vmem>>, %arg6: memref<1x8xf32, #tpu.memory_space<vmem>>, %arg7: memref<1x128x8xf32, #tpu.memory_space<vmem>>, %arg8: memref<10x18x8xf32, #tpu.memory_space<vmem>>, %arg9: memref<10x18x8xf32, #tpu.memory_space<vmem>>) attributes {dimension_semantics = [#tpu.dimension_semantics<parallel>, #tpu.dimension_semantics<parallel>], iteration_bounds = array<i64: 2, 2>, scalar_prefetch = 0 : i64, scratch_operands = 2 : i64, tpu.core_type = #tpu.core_type<tc>, window_params = [{transform_indices = @transform_0, window_bounds = array<i64: 1, 1, 12, 18, 4>}, {pipeline_mode = #tpu.pipeline_mode<synchronous>, transform_indices = @transform_1, window_bounds = array<i64: 9, 4, 8>}, {pipeline_mode = #tpu.pipeline_mode<synchronous>, transform_indices = @transform_2, window_bounds = array<i64: 1, 8>}, {pipeline_mode = #tpu.pipeline_mode<synchronous>, transform_indices = @transform_3, window_bounds = array<i64: 9, 8, 8>}, {pipeline_mode = #tpu.pipeline_mode<synchronous>, transform_indices = @transform_4, window_bounds = array<i64: 1, 8>}, {transform_indices = @transform_5, window_bounds = array<i64: 1, 128, 8>}]} {
    %cst = arith.constant 0.000000e+00 : f32
    %0 = vector.broadcast %cst : f32 to vector<160x8xf32>
    %c0 = arith.constant 0 : index
    %c0_0 = arith.constant 0 : index
    %c0_1 = arith.constant 0 : index
    %c0_2 = arith.constant 0 : index
    %c0_3 = arith.constant 0 : index
    %1 = vector.load %arg2[%c0, %c0_0, %c0_1, %c0_2, %c0_3] : memref<1x1x12x18x4xf32, #tpu.memory_space<vmem>>, vector<1x1x10x16x4xf32>
    %2 = vector.shape_cast %1 : vector<1x1x10x16x4xf32> to vector<10x16x4xf32>
    %3 = vector.shape_cast %2 : vector<10x16x4xf32> to vector<160x4xf32>
    %c0_4 = arith.constant 0 : index
    %c0_5 = arith.constant 0 : index
    %c0_6 = arith.constant 0 : index
    %4 = vector.load %arg3[%c0_4, %c0_5, %c0_6] : memref<9x4x8xf32, #tpu.memory_space<vmem>>, vector<1x4x8xf32>
    %5 = vector.shape_cast %4 : vector<1x4x8xf32> to vector<4x8xf32>
    %cst_7 = arith.constant dense<0.000000e+00> : vector<160x8xf32>
    %6 = tpu.matmul %3, %5, %cst_7 {dimension_numbers = #tpu.dot_dimension_numbers<[1], [0], [0], [1], [0, 0, 1, 1], [], []>} : vector<160x4xf32>, vector<4x8xf32>, vector<160x8xf32> -> vector<160x8xf32>
    %7 = arith.addf %0, %6 : vector<160x8xf32>
    %c0_8 = arith.constant 0 : index
    %c0_9 = arith.constant 0 : index
    %c0_10 = arith.constant 0 : index
    %c1 = arith.constant 1 : index
    %c0_11 = arith.constant 0 : index
    %8 = vector.load %arg2[%c0_8, %c0_9, %c0_10, %c1, %c0_11] : memref<1x1x12x18x4xf32, #tpu.memory_space<vmem>>, vector<1x1x10x16x4xf32>
    %9 = vector.shape_cast %8 : vector<1x1x10x16x4xf32> to vector<10x16x4xf32>
    %10 = vector.shape_cast %9 : vector<10x16x4xf32> to vector<160x4xf32>
    %c1_12 = arith.constant 1 : index
    %c0_13 = arith.constant 0 : index
    %c0_14 = arith.constant 0 : index
    %11 = vector.load %arg3[%c1_12, %c0_13, %c0_14] : memref<9x4x8xf32, #tpu.memory_space<vmem>>, vector<1x4x8xf32>
    %12 = vector.shape_cast %11 : vector<1x4x8xf32> to vector<4x8xf32>
    %cst_15 = arith.constant dense<0.000000e+00> : vector<160x8xf32>
    %13 = tpu.matmul %10, %12, %cst_15 {dimension_numbers = #tpu.dot_dimension_numbers<[1], [0], [0], [1], [0, 0, 1, 1], [], []>} : vector<160x4xf32>, vector<4x8xf32>, vector<160x8xf32> -> vector<160x8xf32>
    %14 = arith.addf %7, %13 : vector<160x8xf32>
    %c0_16 = arith.constant 0 : index
    %c0_17 = arith.constant 0 : index
    %c0_18 = arith.constant 0 : index
    %c2 = arith.constant 2 : index
    %c0_19 = arith.constant 0 : index
    %15 = vector.load %arg2[%c0_16, %c0_17, %c0_18, %c2, %c0_19] : memref<1x1x12x18x4xf32, #tpu.memory_space<vmem>>, vector<1x1x10x16x4xf32>
    %16 = vector.shape_cast %15 : vector<1x1x10x16x4xf32> to vector<10x16x4xf32>
    %17 = vector.shape_cast %16 : vector<10x16x4xf32> to vector<160x4xf32>
    %c2_20 = arith.constant 2 : index
    %c0_21 = arith.constant 0 : index
    %c0_22 = arith.constant 0 : index
    %18 = vector.load %arg3[%c2_20, %c0_21, %c0_22] : memref<9x4x8xf32, #tpu.memory_space<vmem>>, vector<1x4x8xf32>
    %19 = vector.shape_cast %18 : vector<1x4x8xf32> to vector<4x8xf32>
    %cst_23 = arith.constant dense<0.000000e+00> : vector<160x8xf32>
    %20 = tpu.matmul %17, %19, %cst_23 {dimension_numbers = #tpu.dot_dimension_numbers<[1], [0], [0], [1], [0, 0, 1, 1], [], []>} : vector<160x4xf32>, vector<4x8xf32>, vector<160x8xf32> -> vector<160x8xf32>
    %21 = arith.addf %14, %20 : vector<160x8xf32>
    %c0_24 = arith.constant 0 : index
    %c0_25 = arith.constant 0 : index
    %c1_26 = arith.constant 1 : index
    %c0_27 = arith.constant 0 : index
    %c0_28 = arith.constant 0 : index
    %22 = vector.load %arg2[%c0_24, %c0_25, %c1_26, %c0_27, %c0_28] : memref<1x1x12x18x4xf32, #tpu.memory_space<vmem>>, vector<1x1x10x16x4xf32>
    %23 = vector.shape_cast %22 : vector<1x1x10x16x4xf32> to vector<10x16x4xf32>
    %24 = vector.shape_cast %23 : vector<10x16x4xf32> to vector<160x4xf32>
    %c3 = arith.constant 3 : index
    %c0_29 = arith.constant 0 : index
    %c0_30 = arith.constant 0 : index
    %25 = vector.load %arg3[%c3, %c0_29, %c0_30] : memref<9x4x8xf32, #tpu.memory_space<vmem>>, vector<1x4x8xf32>
    %26 = vector.shape_cast %25 : vector<1x4x8xf32> to vector<4x8xf32>
    %cst_31 = arith.constant dense<0.000000e+00> : vector<160x8xf32>
    %27 = tpu.matmul %24, %26, %cst_31 {dimension_numbers = #tpu.dot_dimension_numbers<[1], [0], [0], [1], [0, 0, 1, 1], [], []>} : vector<160x4xf32>, vector<4x8xf32>, vector<160x8xf32> -> vector<160x8xf32>
    %28 = arith.addf %21, %27 : vector<160x8xf32>
    %c0_32 = arith.constant 0 : index
    %c0_33 = arith.constant 0 : index
    %c1_34 = arith.constant 1 : index
    %c1_35 = arith.constant 1 : index
    %c0_36 = arith.constant 0 : index
    %29 = vector.load %arg2[%c0_32, %c0_33, %c1_34, %c1_35, %c0_36] : memref<1x1x12x18x4xf32, #tpu.memory_space<vmem>>, vector<1x1x10x16x4xf32>
    %30 = vector.shape_cast %29 : vector<1x1x10x16x4xf32> to vector<10x16x4xf32>
    %31 = vector.shape_cast %30 : vector<10x16x4xf32> to vector<160x4xf32>
    %c4 = arith.constant 4 : index
    %c0_37 = arith.constant 0 : index
    %c0_38 = arith.constant 0 : index
    %32 = vector.load %arg3[%c4, %c0_37, %c0_38] : memref<9x4x8xf32, #tpu.memory_space<vmem>>, vector<1x4x8xf32>
    %33 = vector.shape_cast %32 : vector<1x4x8xf32> to vector<4x8xf32>
    %cst_39 = arith.constant dense<0.000000e+00> : vector<160x8xf32>
    %34 = tpu.matmul %31, %33, %cst_39 {dimension_numbers = #tpu.dot_dimension_numbers<[1], [0], [0], [1], [0, 0, 1, 1], [], []>} : vector<160x4xf32>, vector<4x8xf32>, vector<160x8xf32> -> vector<160x8xf32>
    %35 = arith.addf %28, %34 : vector<160x8xf32>
    %c0_40 = arith.constant 0 : index
    %c0_41 = arith.constant 0 : index
    %c1_42 = arith.constant 1 : index
    %c2_43 = arith.constant 2 : index
    %c0_44 = arith.constant 0 : index
    %36 = vector.load %arg2[%c0_40, %c0_41, %c1_42, %c2_43, %c0_44] : memref<1x1x12x18x4xf32, #tpu.memory_space<vmem>>, vector<1x1x10x16x4xf32>
    %37 = vector.shape_cast %36 : vector<1x1x10x16x4xf32> to vector<10x16x4xf32>
    %38 = vector.shape_cast %37 : vector<10x16x4xf32> to vector<160x4xf32>
    %c5 = arith.constant 5 : index
    %c0_45 = arith.constant 0 : index
    %c0_46 = arith.constant 0 : index
    %39 = vector.load %arg3[%c5, %c0_45, %c0_46] : memref<9x4x8xf32, #tpu.memory_space<vmem>>, vector<1x4x8xf32>
    %40 = vector.shape_cast %39 : vector<1x4x8xf32> to vector<4x8xf32>
    %cst_47 = arith.constant dense<0.000000e+00> : vector<160x8xf32>
    %41 = tpu.matmul %38, %40, %cst_47 {dimension_numbers = #tpu.dot_dimension_numbers<[1], [0], [0], [1], [0, 0, 1, 1], [], []>} : vector<160x4xf32>, vector<4x8xf32>, vector<160x8xf32> -> vector<160x8xf32>
    %42 = arith.addf %35, %41 : vector<160x8xf32>
    %c0_48 = arith.constant 0 : index
    %c0_49 = arith.constant 0 : index
    %c2_50 = arith.constant 2 : index
    %c0_51 = arith.constant 0 : index
    %c0_52 = arith.constant 0 : index
    %43 = vector.load %arg2[%c0_48, %c0_49, %c2_50, %c0_51, %c0_52] : memref<1x1x12x18x4xf32, #tpu.memory_space<vmem>>, vector<1x1x10x16x4xf32>
    %44 = vector.shape_cast %43 : vector<1x1x10x16x4xf32> to vector<10x16x4xf32>
    %45 = vector.shape_cast %44 : vector<10x16x4xf32> to vector<160x4xf32>
    %c6 = arith.constant 6 : index
    %c0_53 = arith.constant 0 : index
    %c0_54 = arith.constant 0 : index
    %46 = vector.load %arg3[%c6, %c0_53, %c0_54] : memref<9x4x8xf32, #tpu.memory_space<vmem>>, vector<1x4x8xf32>
    %47 = vector.shape_cast %46 : vector<1x4x8xf32> to vector<4x8xf32>
    %cst_55 = arith.constant dense<0.000000e+00> : vector<160x8xf32>
    %48 = tpu.matmul %45, %47, %cst_55 {dimension_numbers = #tpu.dot_dimension_numbers<[1], [0], [0], [1], [0, 0, 1, 1], [], []>} : vector<160x4xf32>, vector<4x8xf32>, vector<160x8xf32> -> vector<160x8xf32>
    %49 = arith.addf %42, %48 : vector<160x8xf32>
    %c0_56 = arith.constant 0 : index
    %c0_57 = arith.constant 0 : index
    %c2_58 = arith.constant 2 : index
    %c1_59 = arith.constant 1 : index
    %c0_60 = arith.constant 0 : index
    %50 = vector.load %arg2[%c0_56, %c0_57, %c2_58, %c1_59, %c0_60] : memref<1x1x12x18x4xf32, #tpu.memory_space<vmem>>, vector<1x1x10x16x4xf32>
    %51 = vector.shape_cast %50 : vector<1x1x10x16x4xf32> to vector<10x16x4xf32>
    %52 = vector.shape_cast %51 : vector<10x16x4xf32> to vector<160x4xf32>
    %c7 = arith.constant 7 : index
    %c0_61 = arith.constant 0 : index
    %c0_62 = arith.constant 0 : index
    %53 = vector.load %arg3[%c7, %c0_61, %c0_62] : memref<9x4x8xf32, #tpu.memory_space<vmem>>, vector<1x4x8xf32>
    %54 = vector.shape_cast %53 : vector<1x4x8xf32> to vector<4x8xf32>
    %cst_63 = arith.constant dense<0.000000e+00> : vector<160x8xf32>
    %55 = tpu.matmul %52, %54, %cst_63 {dimension_numbers = #tpu.dot_dimension_numbers<[1], [0], [0], [1], [0, 0, 1, 1], [], []>} : vector<160x4xf32>, vector<4x8xf32>, vector<160x8xf32> -> vector<160x8xf32>
    %56 = arith.addf %49, %55 : vector<160x8xf32>
    %c0_64 = arith.constant 0 : index
    %c0_65 = arith.constant 0 : index
    %c2_66 = arith.constant 2 : index
    %c2_67 = arith.constant 2 : index
    %c0_68 = arith.constant 0 : index
    %57 = vector.load %arg2[%c0_64, %c0_65, %c2_66, %c2_67, %c0_68] : memref<1x1x12x18x4xf32, #tpu.memory_space<vmem>>, vector<1x1x10x16x4xf32>
    %58 = vector.shape_cast %57 : vector<1x1x10x16x4xf32> to vector<10x16x4xf32>
    %59 = vector.shape_cast %58 : vector<10x16x4xf32> to vector<160x4xf32>
    %c8 = arith.constant 8 : index
    %c0_69 = arith.constant 0 : index
    %c0_70 = arith.constant 0 : index
    %60 = vector.load %arg3[%c8, %c0_69, %c0_70] : memref<9x4x8xf32, #tpu.memory_space<vmem>>, vector<1x4x8xf32>
    %61 = vector.shape_cast %60 : vector<1x4x8xf32> to vector<4x8xf32>
    %cst_71 = arith.constant dense<0.000000e+00> : vector<160x8xf32>
    %62 = tpu.matmul %59, %61, %cst_71 {dimension_numbers = #tpu.dot_dimension_numbers<[1], [0], [0], [1], [0, 0, 1, 1], [], []>} : vector<160x4xf32>, vector<4x8xf32>, vector<160x8xf32> -> vector<160x8xf32>
    %63 = arith.addf %56, %62 : vector<160x8xf32>
    %c0_72 = arith.constant 0 : index
    %c0_73 = arith.constant 0 : index
    %64 = vector.load %arg4[%c0_72, %c0_73] : memref<1x8xf32, #tpu.memory_space<vmem>>, vector<1x8xf32>
    %65 = vector.broadcast %64 : vector<1x8xf32> to vector<160x8xf32>
    %66 = arith.addf %63, %65 : vector<160x8xf32>
    %cst_74 = arith.constant 0.000000e+00 : f32
    %67 = vector.broadcast %cst_74 : f32 to vector<160x8xf32>
    %68 = arith.cmpf ogt, %66, %67 : vector<160x8xf32>
    %cst_75 = arith.constant 0.00999999977 : f32
    %69 = vector.broadcast %cst_75 : f32 to vector<160x8xf32>
    %70 = arith.mulf %69, %66 : vector<160x8xf32>
    %71 = arith.select %68, %66, %70 : vector<160x8xi1>, vector<160x8xf32>
    %72 = vector.shape_cast %71 : vector<160x8xf32> to vector<10x16x8xf32>
    %c0_76 = arith.constant 0 : index
    %c1_77 = arith.constant 1 : index
    %c0_78 = arith.constant 0 : index
    %73 = vector.load %arg8[%c0_76, %c1_77, %c0_78] : memref<10x18x8xf32, #tpu.memory_space<vmem>>, vector<10x16x8xf32>
    tpu.vector_store %arg8[%c0_76, %c1_77, %c0_78], %72 {strides = array<i32>} : memref<10x18x8xf32, #tpu.memory_space<vmem>>, vector<10x16x8xf32>,
    %74 = vector.extract_strided_slice %72 {offsets = [0, 1, 0], sizes = [10, 1, 8], strides = [1, 1, 1]} : vector<10x16x8xf32> to vector<10x1x8xf32>
    %c0_79 = arith.constant 0 : index
    %c0_80 = arith.constant 0 : index
    %c0_81 = arith.constant 0 : index
    %75 = vector.load %arg8[%c0_79, %c0_80, %c0_81] : memref<10x18x8xf32, #tpu.memory_space<vmem>>, vector<10x1x8xf32>
    tpu.vector_store %arg8[%c0_79, %c0_80, %c0_81], %74 {strides = array<i32>} : memref<10x18x8xf32, #tpu.memory_space<vmem>>, vector<10x1x8xf32>,
    %76 = vector.extract_strided_slice %72 {offsets = [0, 14, 0], sizes = [10, 1, 8], strides = [1, 1, 1]} : vector<10x16x8xf32> to vector<10x1x8xf32>
    %c0_82 = arith.constant 0 : index
    %c17 = arith.constant 17 : index
    %c0_83 = arith.constant 0 : index
    %77 = vector.load %arg8[%c0_82, %c17, %c0_83] : memref<10x18x8xf32, #tpu.memory_space<vmem>>, vector<10x1x8xf32>
    tpu.vector_store %arg8[%c0_82, %c17, %c0_83], %76 {strides = array<i32>} : memref<10x18x8xf32, #tpu.memory_space<vmem>>, vector<10x1x8xf32>,
    %c8_i32 = arith.constant 8 : i32
    %78 = arith.muli %arg1, %c8_i32 : i32
    %c1_i32 = arith.constant 1 : i32
    %79 = arith.subi %78, %c1_i32 : i32
    %c0_i32 = arith.constant 0 : i32
    %c6_i32 = arith.constant 6 : i32
    %80 = arith.maxsi %c0_i32, %79 : i32
    %81 = arith.minsi %c6_i32, %80 : i32
    %c0_i32_84 = arith.constant 0 : i32
    %82 = arith.cmpi eq, %78, %c0_i32_84 : i32
    %c1_i32_85 = arith.constant 1 : i32
    %83 = arith.subi %78, %c1_i32_85 : i32
    %c1_i32_86 = arith.constant 1 : i32
    %84 = arith.select %82, %c1_i32_86, %83 : i32
    %85 = arith.subi %84, %81 : i32
    %86 = arith.subi %78, %81 : i32
    %c8_i32_87 = arith.constant 8 : i32
    %87 = arith.addi %78, %c8_i32_87 : i32
    %c16_i32 = arith.constant 16 : i32
    %88 = arith.cmpi sge, %87, %c16_i32 : i32
    %c8_i32_88 = arith.constant 8 : i32
    %89 = arith.addi %78, %c8_i32_88 : i32
    %c14_i32 = arith.constant 14 : i32
    %90 = arith.select %88, %c14_i32, %89 : i32
    %91 = arith.subi %90, %81 : i32
    %92 = arith.index_cast %85 : i32 to index
    %c0_89 = arith.constant 0 : index
    %c0_90 = arith.constant 0 : index
    %93 = vector.load %arg8[%92, %c0_89, %c0_90] : memref<10x18x8xf32, #tpu.memory_space<vmem>>, vector<1x18x8xf32>
    %c0_91 = arith.constant 0 : index
    %c0_92 = arith.constant 0 : index
    %c0_93 = arith.constant 0 : index
    %94 = vector.load %arg9[%c0_91, %c0_92, %c0_93] : memref<10x18x8xf32, #tpu.memory_space<vmem>>, vector<1x18x8xf32>
    tpu.vector_store %arg9[%c0_91, %c0_92, %c0_93], %93 {strides = array<i32>} : memref<10x18x8xf32, #tpu.memory_space<vmem>>, vector<1x18x8xf32>,
    %95 = arith.index_cast %86 : i32 to index
    %c0_94 = arith.constant 0 : index
    %c0_95 = arith.constant 0 : index
    %96 = vector.load %arg8[%95, %c0_94, %c0_95] : memref<10x18x8xf32, #tpu.memory_space<vmem>>, vector<8x18x8xf32>
    %c1_96 = arith.constant 1 : index
    %c0_97 = arith.constant 0 : index
    %c0_98 = arith.constant 0 : index
    %97 = vector.load %arg9[%c1_96, %c0_97, %c0_98] : memref<10x18x8xf32, #tpu.memory_space<vmem>>, vector<8x18x8xf32>
    tpu.vector_store %arg9[%c1_96, %c0_97, %c0_98], %96 {strides = array<i32>} : memref<10x18x8xf32, #tpu.memory_space<vmem>>, vector<8x18x8xf32>,
    %98 = arith.index_cast %91 : i32 to index
    %c0_99 = arith.constant 0 : index
    %c0_100 = arith.constant 0 : index
    %99 = vector.load %arg8[%98, %c0_99, %c0_100] : memref<10x18x8xf32, #tpu.memory_space<vmem>>, vector<1x18x8xf32>
    %c9 = arith.constant 9 : index
    %c0_101 = arith.constant 0 : index
    %c0_102 = arith.constant 0 : index
    %100 = vector.load %arg9[%c9, %c0_101, %c0_102] : memref<10x18x8xf32, #tpu.memory_space<vmem>>, vector<1x18x8xf32>
    tpu.vector_store %arg9[%c9, %c0_101, %c0_102], %99 {strides = array<i32>} : memref<10x18x8xf32, #tpu.memory_space<vmem>>, vector<1x18x8xf32>,
    %cst_103 = arith.constant 0.000000e+00 : f32
    %101 = vector.broadcast %cst_103 : f32 to vector<128x8xf32>
    %c0_104 = arith.constant 0 : index
    %c0_105 = arith.constant 0 : index
    %c0_106 = arith.constant 0 : index
    %102 = vector.load %arg9[%c0_104, %c0_105, %c0_106] : memref<10x18x8xf32, #tpu.memory_space<vmem>>, vector<8x16x8xf32>
    %103 = vector.shape_cast %102 : vector<8x16x8xf32> to vector<128x8xf32>
    %c0_107 = arith.constant 0 : index
    %c0_108 = arith.constant 0 : index
    %c0_109 = arith.constant 0 : index
    %104 = vector.load %arg5[%c0_107, %c0_108, %c0_109] : memref<9x8x8xf32, #tpu.memory_space<vmem>>, vector<1x8x8xf32>
    %105 = vector.shape_cast %104 : vector<1x8x8xf32> to vector<8x8xf32>
    %cst_110 = arith.constant dense<0.000000e+00> : vector<128x8xf32>
    %106 = tpu.matmul %103, %105, %cst_110 {dimension_numbers = #tpu.dot_dimension_numbers<[1], [0], [0], [1], [0, 0, 1, 1], [], []>} : vector<128x8xf32>, vector<8x8xf32>, vector<128x8xf32> -> vector<128x8xf32>
    %107 = arith.addf %101, %106 : vector<128x8xf32>
    %c0_111 = arith.constant 0 : index
    %c1_112 = arith.constant 1 : index
    %c0_113 = arith.constant 0 : index
    %108 = vector.load %arg9[%c0_111, %c1_112, %c0_113] : memref<10x18x8xf32, #tpu.memory_space<vmem>>, vector<8x16x8xf32>
    %109 = vector.shape_cast %108 : vector<8x16x8xf32> to vector<128x8xf32>
    %c1_114 = arith.constant 1 : index
    %c0_115 = arith.constant 0 : index
    %c0_116 = arith.constant 0 : index
    %110 = vector.load %arg5[%c1_114, %c0_115, %c0_116] : memref<9x8x8xf32, #tpu.memory_space<vmem>>, vector<1x8x8xf32>
    %111 = vector.shape_cast %110 : vector<1x8x8xf32> to vector<8x8xf32>
    %cst_117 = arith.constant dense<0.000000e+00> : vector<128x8xf32>
    %112 = tpu.matmul %109, %111, %cst_117 {dimension_numbers = #tpu.dot_dimension_numbers<[1], [0], [0], [1], [0, 0, 1, 1], [], []>} : vector<128x8xf32>, vector<8x8xf32>, vector<128x8xf32> -> vector<128x8xf32>
    %113 = arith.addf %107, %112 : vector<128x8xf32>
    %c0_118 = arith.constant 0 : index
    %c2_119 = arith.constant 2 : index
    %c0_120 = arith.constant 0 : index
    %114 = vector.load %arg9[%c0_118, %c2_119, %c0_120] : memref<10x18x8xf32, #tpu.memory_space<vmem>>, vector<8x16x8xf32>
    %115 = vector.shape_cast %114 : vector<8x16x8xf32> to vector<128x8xf32>
    %c2_121 = arith.constant 2 : index
    %c0_122 = arith.constant 0 : index
    %c0_123 = arith.constant 0 : index
    %116 = vector.load %arg5[%c2_121, %c0_122, %c0_123] : memref<9x8x8xf32, #tpu.memory_space<vmem>>, vector<1x8x8xf32>
    %117 = vector.shape_cast %116 : vector<1x8x8xf32> to vector<8x8xf32>
    %cst_124 = arith.constant dense<0.000000e+00> : vector<128x8xf32>
    %118 = tpu.matmul %115, %117, %cst_124 {dimension_numbers = #tpu.dot_dimension_numbers<[1], [0], [0], [1], [0, 0, 1, 1], [], []>} : vector<128x8xf32>, vector<8x8xf32>, vector<128x8xf32> -> vector<128x8xf32>
    %119 = arith.addf %113, %118 : vector<128x8xf32>
    %c1_125 = arith.constant 1 : index
    %c0_126 = arith.constant 0 : index
    %c0_127 = arith.constant 0 : index
    %120 = vector.load %arg9[%c1_125, %c0_126, %c0_127] : memref<10x18x8xf32, #tpu.memory_space<vmem>>, vector<8x16x8xf32>
    %121 = vector.shape_cast %120 : vector<8x16x8xf32> to vector<128x8xf32>
    %c3_128 = arith.constant 3 : index
    %c0_129 = arith.constant 0 : index
    %c0_130 = arith.constant 0 : index
    %122 = vector.load %arg5[%c3_128, %c0_129, %c0_130] : memref<9x8x8xf32, #tpu.memory_space<vmem>>, vector<1x8x8xf32>
    %123 = vector.shape_cast %122 : vector<1x8x8xf32> to vector<8x8xf32>
    %cst_131 = arith.constant dense<0.000000e+00> : vector<128x8xf32>
    %124 = tpu.matmul %121, %123, %cst_131 {dimension_numbers = #tpu.dot_dimension_numbers<[1], [0], [0], [1], [0, 0, 1, 1], [], []>} : vector<128x8xf32>, vector<8x8xf32>, vector<128x8xf32> -> vector<128x8xf32>
    %125 = arith.addf %119, %124 : vector<128x8xf32>
    %c1_132 = arith.constant 1 : index
    %c1_133 = arith.constant 1 : index
    %c0_134 = arith.constant 0 : index
    %126 = vector.load %arg9[%c1_132, %c1_133, %c0_134] : memref<10x18x8xf32, #tpu.memory_space<vmem>>, vector<8x16x8xf32>
    %127 = vector.shape_cast %126 : vector<8x16x8xf32> to vector<128x8xf32>
    %c4_135 = arith.constant 4 : index
    %c0_136 = arith.constant 0 : index
    %c0_137 = arith.constant 0 : index
    %128 = vector.load %arg5[%c4_135, %c0_136, %c0_137] : memref<9x8x8xf32, #tpu.memory_space<vmem>>, vector<1x8x8xf32>
    %129 = vector.shape_cast %128 : vector<1x8x8xf32> to vector<8x8xf32>
    %cst_138 = arith.constant dense<0.000000e+00> : vector<128x8xf32>
    %130 = tpu.matmul %127, %129, %cst_138 {dimension_numbers = #tpu.dot_dimension_numbers<[1], [0], [0], [1], [0, 0, 1, 1], [], []>} : vector<128x8xf32>, vector<8x8xf32>, vector<128x8xf32> -> vector<128x8xf32>
    %131 = arith.addf %125, %130 : vector<128x8xf32>
    %c1_139 = arith.constant 1 : index
    %c2_140 = arith.constant 2 : index
    %c0_141 = arith.constant 0 : index
    %132 = vector.load %arg9[%c1_139, %c2_140, %c0_141] : memref<10x18x8xf32, #tpu.memory_space<vmem>>, vector<8x16x8xf32>
    %133 = vector.shape_cast %132 : vector<8x16x8xf32> to vector<128x8xf32>
    %c5_142 = arith.constant 5 : index
    %c0_143 = arith.constant 0 : index
    %c0_144 = arith.constant 0 : index
    %134 = vector.load %arg5[%c5_142, %c0_143, %c0_144] : memref<9x8x8xf32, #tpu.memory_space<vmem>>, vector<1x8x8xf32>
    %135 = vector.shape_cast %134 : vector<1x8x8xf32> to vector<8x8xf32>
    %cst_145 = arith.constant dense<0.000000e+00> : vector<128x8xf32>
    %136 = tpu.matmul %133, %135, %cst_145 {dimension_numbers = #tpu.dot_dimension_numbers<[1], [0], [0], [1], [0, 0, 1, 1], [], []>} : vector<128x8xf32>, vector<8x8xf32>, vector<128x8xf32> -> vector<128x8xf32>
    %137 = arith.addf %131, %136 : vector<128x8xf32>
    %c2_146 = arith.constant 2 : index
    %c0_147 = arith.constant 0 : index
    %c0_148 = arith.constant 0 : index
    %138 = vector.load %arg9[%c2_146, %c0_147, %c0_148] : memref<10x18x8xf32, #tpu.memory_space<vmem>>, vector<8x16x8xf32>
    %139 = vector.shape_cast %138 : vector<8x16x8xf32> to vector<128x8xf32>
    %c6_149 = arith.constant 6 : index
    %c0_150 = arith.constant 0 : index
    %c0_151 = arith.constant 0 : index
    %140 = vector.load %arg5[%c6_149, %c0_150, %c0_151] : memref<9x8x8xf32, #tpu.memory_space<vmem>>, vector<1x8x8xf32>
    %141 = vector.shape_cast %140 : vector<1x8x8xf32> to vector<8x8xf32>
    %cst_152 = arith.constant dense<0.000000e+00> : vector<128x8xf32>
    %142 = tpu.matmul %139, %141, %cst_152 {dimension_numbers = #tpu.dot_dimension_numbers<[1], [0], [0], [1], [0, 0, 1, 1], [], []>} : vector<128x8xf32>, vector<8x8xf32>, vector<128x8xf32> -> vector<128x8xf32>
    %143 = arith.addf %137, %142 : vector<128x8xf32>
    %c2_153 = arith.constant 2 : index
    %c1_154 = arith.constant 1 : index
    %c0_155 = arith.constant 0 : index
    %144 = vector.load %arg9[%c2_153, %c1_154, %c0_155] : memref<10x18x8xf32, #tpu.memory_space<vmem>>, vector<8x16x8xf32>
    %145 = vector.shape_cast %144 : vector<8x16x8xf32> to vector<128x8xf32>
    %c7_156 = arith.constant 7 : index
    %c0_157 = arith.constant 0 : index
    %c0_158 = arith.constant 0 : index
    %146 = vector.load %arg5[%c7_156, %c0_157, %c0_158] : memref<9x8x8xf32, #tpu.memory_space<vmem>>, vector<1x8x8xf32>
    %147 = vector.shape_cast %146 : vector<1x8x8xf32> to vector<8x8xf32>
    %cst_159 = arith.constant dense<0.000000e+00> : vector<128x8xf32>
    %148 = tpu.matmul %145, %147, %cst_159 {dimension_numbers = #tpu.dot_dimension_numbers<[1], [0], [0], [1], [0, 0, 1, 1], [], []>} : vector<128x8xf32>, vector<8x8xf32>, vector<128x8xf32> -> vector<128x8xf32>
    %149 = arith.addf %143, %148 : vector<128x8xf32>
    %c2_160 = arith.constant 2 : index
    %c2_161 = arith.constant 2 : index
    %c0_162 = arith.constant 0 : index
    %150 = vector.load %arg9[%c2_160, %c2_161, %c0_162] : memref<10x18x8xf32, #tpu.memory_space<vmem>>, vector<8x16x8xf32>
    %151 = vector.shape_cast %150 : vector<8x16x8xf32> to vector<128x8xf32>
    %c8_163 = arith.constant 8 : index
    %c0_164 = arith.constant 0 : index
    %c0_165 = arith.constant 0 : index
    %152 = vector.load %arg5[%c8_163, %c0_164, %c0_165] : memref<9x8x8xf32, #tpu.memory_space<vmem>>, vector<1x8x8xf32>
    %153 = vector.shape_cast %152 : vector<1x8x8xf32> to vector<8x8xf32>
    %cst_166 = arith.constant dense<0.000000e+00> : vector<128x8xf32>
    %154 = tpu.matmul %151, %153, %cst_166 {dimension_numbers = #tpu.dot_dimension_numbers<[1], [0], [0], [1], [0, 0, 1, 1], [], []>} : vector<128x8xf32>, vector<8x8xf32>, vector<128x8xf32> -> vector<128x8xf32>
    %155 = arith.addf %149, %154 : vector<128x8xf32>
    %c0_167 = arith.constant 0 : index
    %c0_168 = arith.constant 0 : index
    %156 = vector.load %arg6[%c0_167, %c0_168] : memref<1x8xf32, #tpu.memory_space<vmem>>, vector<1x8xf32>
    %157 = vector.broadcast %156 : vector<1x8xf32> to vector<128x8xf32>
    %158 = arith.addf %155, %157 : vector<128x8xf32>
    %cst_169 = arith.constant 0.000000e+00 : f32
    %159 = vector.broadcast %cst_169 : f32 to vector<128x8xf32>
    %160 = arith.cmpf ogt, %158, %159 : vector<128x8xf32>
    %cst_170 = arith.constant 0.00999999977 : f32
    %161 = vector.broadcast %cst_170 : f32 to vector<128x8xf32>
    %162 = arith.mulf %161, %158 : vector<128x8xf32>
    %163 = arith.select %160, %158, %162 : vector<128x8xi1>, vector<128x8xf32>
    %c0_171 = arith.constant 0 : index
    %c0_172 = arith.constant 0 : index
    %c0_173 = arith.constant 0 : index
    %164 = vector.load %arg7[%c0_171, %c0_172, %c0_173] : memref<1x128x8xf32, #tpu.memory_space<vmem>>, vector<1x128x8xf32>
    %165 = vector.shape_cast %164 : vector<1x128x8xf32> to vector<128x8xf32>
    %166 = vector.shape_cast %163 : vector<128x8xf32> to vector<1x128x8xf32>
    tpu.vector_store %arg7[%c0_171, %c0_172, %c0_173], %166 {strides = array<i32>} : memref<1x128x8xf32, #tpu.memory_space<vmem>>, vector<1x128x8xf32>,
    return
  }
  func.func @transform_0(%arg0: i32, %arg1: i32) -> (i32, i32, i32, i32, i32) {
    %c0_i32 = arith.constant 0 : i32
    %c0_i32_0 = arith.constant 0 : i32
    %c0_i32_1 = arith.constant 0 : i32
    %c0_i32_2 = arith.constant 0 : i32
    return %arg0, %arg1, %c0_i32, %c0_i32_0, %c0_i32_1 : i32, i32, i32, i32, i32
  }
  func.func @transform_1(%arg0: i32, %arg1: i32) -> (i32, i32, i32) {
    %c0_i32 = arith.constant 0 : i32
    %c0_i32_0 = arith.constant 0 : i32
    %c0_i32_1 = arith.constant 0 : i32
    %c0_i32_2 = arith.constant 0 : i32
    return %c0_i32, %c0_i32_0, %c0_i32_1 : i32, i32, i32
  }
  func.func @transform_2(%arg0: i32, %arg1: i32) -> (i32, i32) {
    %c0_i32 = arith.constant 0 : i32
    %c0_i32_0 = arith.constant 0 : i32
    %c0_i32_1 = arith.constant 0 : i32
    return %c0_i32, %c0_i32_0 : i32, i32
  }
  func.func @transform_3(%arg0: i32, %arg1: i32) -> (i32, i32, i32) {
    %c0_i32 = arith.constant 0 : i32
    %c0_i32_0 = arith.constant 0 : i32
    %c0_i32_1 = arith.constant 0 : i32
    %c0_i32_2 = arith.constant 0 : i32
    return %c0_i32, %c0_i32_0, %c0_i32_1 : i32, i32, i32
  }
  func.func @transform_4(%arg0: i32, %arg1: i32) -> (i32, i32) {
    %c0_i32 = arith.constant 0 : i32
    %c0_i32_0 = arith.constant 0 : i32
    %c0_i32_1 = arith.constant 0 : i32
    return %c0_i32, %c0_i32_0 : i32, i32
  }
  func.func @transform_5(%arg0: i32, %arg1: i32) -> (i32, i32, i32) {
    %c0_i32 = arith.constant 0 : i32
    %c0_i32_0 = arith.constant 0 : i32
    return %arg0, %arg1, %c0_i32 : i32, i32, i32
  }
}

</mosaic_0001>

<bundles_post_ra>
// kernel: conv_block_forward.1
= control target key start
LH: loop header
LB: loop body
LE: loop exit
PB: predicated region body
PF: predicated region fallthrough
CT: control target
= control target key end

     0   :  { %s6822_s18 = smov 0   ;;  %s6824_s19 = smov 0   ;;  %s8097_s0 = inlined_call_operand.vmem [shape: f32[2,2,12,18,4], index: 0, kind: input, shape index: {}]   ;;  %s8098_s1 = inlined_call_operand.vmem [shape: f32[9,4,8], index: 1, kind: input, shape index: {}]   ;;  %s8099_s2 = inlined_call_operand.vmem [shape: f32[1,8], index: 2, kind: input, shape index: {}]   ;;  %s8100_s3 = inlined_call_operand.vmem [shape: f32[9,8,8], index: 3, kind: input, shape index: {}]   ;;  %s8101_s4 = inlined_call_operand.vmem [shape: f32[1,8], index: 4, kind: input, shape index: {}]   ;;  %s8102_s5 = inlined_call_operand.vmem [shape: f32[2,256,8], index: 5, kind: output, shape index: {}]  }
   0x1   :  { %s6826_s20 = smov 0   ;;  %s6828_s21 = smov 0  }
   0x2   :  { %s6830_s22 = smov 0  }
   0x3 LB: > { %s24_s23 = sadd.s32 1, %s6782_s20  ;;  %s27_s24 = sadd.s32 1, %s6786_s21  ;;  %s6790_s22 = sphi %s6830_s22, %s15_s22   ;;  %s6786_s21 = sphi %s6828_s21, %s8106_s21   ;;  %s6782_s20 = sphi %s6826_s20, %s8105_s20   ;;  %s6778_s19 = sphi %s6824_s19, %s8104_s19   ;;  %s6774_s18 = sphi %s6822_s18, %s8103_s18  }
   0x4   : > { %p25_p0 = scmp.ge.s32.totalorder %s24_s23, 2  ;;  %p5069_p1 = scmp.ge.s32.totalorder %s6790_s22, 1 }
   0x5   : > { %p207_p2 = scmp.lt.s32.totalorder %s6790_s22, 5 }
   0x6   : > { %s8108_s23 = smov (%p25_p0, %s24_s23), 0  ;;  %s8110_s24 = smov (!%p25_p0, %s27_s24), %s6786_s21 }
   0x7   : > { %p208_p3 = pnand %p5069_p1, %p207_p2  ;;  %p29_p4 = scmp.ge.s32.totalorder %s8110_s24, 2 }
   0x8   : > { %v5074_v0 = vld [vmem:[%s8098_s1 + $0x4] sm:$0xf] (!%p208_p3)  ;;  %vm366_vm0 = vcmask (!%p208_p3), 1043456   ;;  %p243_p5 = scmp.lt.s32.totalorder (!%p208_p3), %s6778_s19, 1  ;;  %p245_p6 = scmp.lt.s32.totalorder (!%p208_p3), %s6774_s18, 1  ;;  %vm305_vm1 = vcmask (!%p208_p3), 31744  }
   0x9   : > { %s8112_s24 = smov (%p29_p4, %s8110_s24), 0  ;;  %211 = sbr.rel (%p208_p3) target bundleno = 1095 (0x447), region = 40 }
   0xa   : > { %5898 = vmatprep.subr.msk.mxu0 (!%p208_p3), %vm366_vm0, %v5074_v0  ;;  %v282_v1 = vld [vmem:[%s8098_s1] sm:$0xf] (!%p208_p3)  ;;  %6420 = vmatprep.subr.msk.mxu1 (!%p208_p3), %vm366_vm0, %v5074_v0  ;;  %v5117_v5 = vld [vmem:[%s8098_s1 + $0x8] sm:$0xf] (!%p208_p3)  ;;  %v6893_v8 = vld [vmem:[%s8098_s1 + $0xc] sm:$0xf] (!%p208_p3) }
   0xb   : > { %5899 = vmatpush3.msk.msra.mxu0 (!%p208_p3), %vm366_vm0, %v5074_v0  ;;  %6421 = vmatpush3.msk.msra.mxu1 (!%p208_p3), %vm366_vm0, %v5074_v0  ;;  %v5201_v47 = vld [vmem:[%s8098_s1 + $0x10] sm:$0xf] (!%p208_p3)  ;;  %vm2742_vm3 = vcmask (!%p208_p3), 64512   ;;  %vm2774_vm4 = vcmask (!%p208_p3), 63494   ;;  %vm2763_vm6 = vcmask (!%p208_p3), 58369   ;;  %s7527_s14 = sshll.u32 (!%p208_p3), %s6774_s18, 3 }
   0xc   : > { %5930 = vmatprep.subr.msk.mxu0 (!%p208_p3), %vm366_vm0, %v282_v1  ;;  %s7537_s15 = sadd.s32 (!%p208_p3), 4294967295, %s7527_s14  ;;  %p2791_p9 = scmp.eq.s32.totalorder (!%p208_p3), %s7527_s14, 0 }
   0xd   : > { %p2787_p7 = scmp.gt.s32.totalorder (!%p208_p3), %s7537_s15, 0  ;;  %p5394_p8 = scmp.lt.s32.totalorder (!%p208_p3), %s7537_s15, 6 }
  0x10   : > { %s8114_s19 = smov (!%p243_p5, %s6778_s19), 1 }
  0x11   : > { %s246_s29 = scalar_select %p245_p6, %s6774_s18, 1 }
  0x12   : > { %s6711_s30 = smul.u32 72, %s8114_s19 }
  0x13   : > { %s6710_s6 = smul.u32 36, %s246_s29 }
  0x14   : > { %s2788_s16 = scalar_select %p2787_p7, %s7537_s15, 0 }
  0x15   : > { %s249_s7 = sadd.s32 %s6711_s30, %s6710_s6  ;;  %s8118_s15 = smov (%p2791_p9, %s7537_s15), 1 }
  0x16   : > { %s5070_s8 = sshll.u32 %s249_s7, 3  ;;  %s8116_s16 = smov (!%p5394_p8, %s2788_s16), 6 }
  0x17   : > { %s6873_s11 = scalar_lea.vmem %s8097_s0, %s5070_s8  ;;  %s2793_s17 = ssub.s32 %s8118_s15, %s8116_s16 }
  0x18   : > { %v283_v2 = vld [vmem:[%s6873_s11 + $0x1] sm:$0xff]  ;;  %v284_v3 = vld [vmem:[%s6873_s11 + $0x9] sm:$0xff]  ;;  %v6888_v7 = vld [vmem:[%s6873_s11 + $0x18] sm:$0xff]  ;;  %s2794_s25 = ssub.s32 %s7527_s14, %s8116_s16  ;;  %s2799_s26 = smul.u32 24, %s2793_s17 }
  0x19   : > { %v262_v4 = vld [vmem:[%s6873_s11] sm:$0xff]  ;;  %5900 = vmatprep.mubr.msk.f32.mxu0 %vm305_vm1, %v283_v2  ;;  %v263_v6 = vld [vmem:[%s6873_s11 + $0x8] sm:$0xff]  ;;  %v6903_v10 = vld [vmem:[%s6873_s11 + $0x30] sm:$0xff]  ;;  %s2808_s27 = smul.u32 24, %s2794_s25  ;;  %s2795_s30 = sadd.s32 8, %s7527_s14 }
  0x1a   : > { %5901 = vmatmul.mubr.msk.f32.vlgmr.msra.gmra.mrb[0].mxu0 %vm305_vm1, %v284_v3  ;;  %v6900_v9 = vld [vmem:[%s6873_s11 + $0x20] sm:$0xff]  ;;  %v6915_v12 = vld [vmem:[%s6873_s11 + $0x38] sm:$0xff]  ;;  %v6923_v14 = vld [vmem:[%s6873_s11 + $0x48] sm:$0xff]  ;;  %s2800_s28 = scalar_lea.vmem [#allocation2], %s2799_s26  ;;  %p2796_p10 = scmp.ge.s32.totalorder %s2795_s30, 16 }
  0x1b   : > { %5931 = vmatpush3.msk.msra.mxu0 %vm366_vm0, %v282_v1  ;;  %5932 = vmatprep.mubr.msk.f32.mxu0 %vm305_vm1, %v262_v4  ;;  %v6910_v11 = vld [vmem:[%s6873_s11 + $0x19] sm:$0xff]  ;;  %v6918_v13 = vld [vmem:[%s6873_s11 + $0x21] sm:$0xff]  ;;  %v6926_v15 = vld [vmem:[%s6873_s11 + $0x31] sm:$0xff]  ;;  %s7593_s29 = scalar_lea.vmem [#allocation2], %s2808_s27  ;;  %s5072_s6 = sshll.u32 %s8114_s19, 5 }
  0x1c   : > { %5962 = vmatprep.subr.msk.mxu0 %vm366_vm0, %v5117_v5  ;;  %5903 = vmatprep.mubr.msk.f32.mxu1 %vm305_vm1, %v6910_v11  ;;  %v6937_v16 = vld [vmem:[%s6873_s11 + $0x50] sm:$0xff]  ;;  %v6940_v17 = vld [vmem:[%s6873_s11 + $0x39] sm:$0xff]  ;;  %v6957_v20 = vld [vmem:[%s6873_s11 + $0x68] sm:$0xff]  ;;  %s8120_s30 = smov (%p2796_p10, %s2795_s30), 14 }
  0x1d   : > { %5904 = vmatmul.mubr.msk.f32.vlgmr.msra.gmra.mrb[0].mxu1 %vm305_vm1, %v6918_v13  ;;  %v6943_v18 = vld [vmem:[%s6873_s11 + $0x60] sm:$0xff]  ;;  %v6946_v19 = vld [vmem:[%s6873_s11 + $0x49] sm:$0xff]  ;;  %v6960_v21 = vld [vmem:[%s6873_s11 + $0x51] sm:$0xff]  ;;  %s2798_s8 = ssub.s32 %s8120_s30, %s8116_s16  ;;  %s5071_s30 = sshll.u32 %s6774_s18, 4 }
  0x1e   : > { %5906 = vmatprep.mubr.msk.f32.mxu1 %vm305_vm1, %v6926_v15  ;;  %v6963_v22 = vld [vmem:[%s6873_s11 + $0x78] sm:$0xff]  ;;  %v6966_v23 = vld [vmem:[%s6873_s11 + $0x61] sm:$0xff]  ;;  %v6980_v25 = vld [vmem:[%s6873_s11 + $0x69] sm:$0xff]  ;;  %s2859_s9 = smul.u32 24, %s2798_s8  ;;  %p255_p11 = scmp.lt.s32.totalorder %s5071_s30, 31 }
  0x1f   : > { %v6977_v24 = vld [vmem:[%s6873_s11 + $0x80] sm:$0xff]  ;;  %v6983_v26 = vld [vmem:[%s6873_s11 + $0x90] sm:$0xff]  ;;  %v6997_v28 = vld [vmem:[%s6873_s11 + $0x98] sm:$0xff] }
  0x20   : > { %v6986_v27 = vld [vmem:[%s6873_s11 + $0x79] sm:$0xff]  ;;  %v7000_v29 = vld [vmem:[%s6873_s11 + $0x81] sm:$0xff]  ;;  %v7006_v31 = vld [vmem:[%s6873_s11 + $0x91] sm:$0xff]  ;;  %s2860_s10 = scalar_lea.vmem [#allocation2], %s2859_s9  ;;  %s8122_s30 = smov (!%p255_p11, %s5071_s30), 31 }
  0x21   : > { %5907 = vmatmul.mubr.msk.f32.gmra.mrb[2].mxu1 %vm305_vm1, %v6940_v17  ;;  %v7003_v30 = vld [vmem:[%s6873_s11 + $0xa8] sm:$0xff]  ;;  %v7017_v32 = vld [vmem:[%s6873_s11 + $0xb0] sm:$0xff]  ;;  %v7020_v33 = vld [vmem:[%s6873_s11 + $0x99] sm:$0xff]  ;;  %s258_s7 = sadd.s32 %s5072_s6, %s8122_s30 }
  0x22   : > { %5933 = vmatmul.mubr.msk.f32.vlgmr.msra.gmra.mrb[0].mxu0 %vm305_vm1, %v263_v6  ;;  %5909 = vmatprep.mubr.msk.f32.mxu1 %vm305_vm1, %v6946_v19  ;;  %v7023_v34 = vld [vmem:[%s6873_s11 + $0xc0] sm:$0xff]  ;;  %v7026_v35 = vld [vmem:[%s6873_s11 + $0xa9] sm:$0xff]  ;;  %v7040_v37 = vld [vmem:[%s6873_s11 + $0xb1] sm:$0xff] }
  0x23   : > { %5963 = vmatpush3.msk.msra.mxu0 %vm366_vm0, %v5117_v5  ;;  %5935 = vmatprep.mubr.msk.f32.mxu0 %vm305_vm1, %v6888_v7  ;;  %v7037_v36 = vld [vmem:[%s6873_s11 + $0xc8] sm:$0xff]  ;;  %v7043_v38 = vld [vmem:[%s6873_s11 + $0xd8] sm:$0xff]  ;;  %v7057_v40 = vld [vmem:[%s6873_s11 + $0xe0] sm:$0xff] }
  0x24   : > { %5994 = vmatprep.subr.msk.mxu0 %vm366_vm0, %v6893_v8  ;;  %v7046_v39 = vld [vmem:[%s6873_s11 + $0xc1] sm:$0xff]  ;;  %v7060_v41 = vld [vmem:[%s6873_s11 + $0xc9] sm:$0xff]  ;;  %v7064_v43 = vld [vmem:[%s6873_s11 + $0xd9] sm:$0xff] }
  0x25   : > { %5910 = vmatmul.mubr.msk.f32.gmra.mrb[4].mxu1 %vm305_vm1, %v6960_v21  ;;  %v763_v42 = vld [vmem:[%s6873_s11 + $0x2] sm:$0xff]  ;;  %v764_v44 = vld [vmem:[%s6873_s11 + $0xa] sm:$0xff]  ;;  %v7078_v46 = vld [vmem:[%s6873_s11 + $0x1a] sm:$0xff] }
  0x26   : > { %5936 = vmatmul.mubr.msk.f32.gmra.mrb[2].mxu0 %vm305_vm1, %v6900_v9  ;;  %5912 = vmatprep.mubr.msk.f32.mxu1 %vm305_vm1, %v6966_v23  ;;  %v7075_v45 = vld [vmem:[%s6873_s11 + $0xe1] sm:$0xff]  ;;  %v7094_v49 = vld [vmem:[%s6873_s11 + $0x32] sm:$0xff]  ;;  %v7105_v51 = vld [vmem:[%s6873_s11 + $0x4a] sm:$0xff] }
  0x27   : > { %5938 = vmatprep.mubr.msk.f32.mxu0 %vm305_vm1, %v6903_v10  ;;  %v7091_v48 = vld [vmem:[%s6873_s11 + $0x22] sm:$0xff]  ;;  %v7102_v50 = vld [vmem:[%s6873_s11 + $0x3a] sm:$0xff]  ;;  %v7112_v52 = vld [vmem:[%s6873_s11 + $0x52] sm:$0xff] }
  0x28   : > { %v7115_v53 = vld [vmem:[%s6873_s11 + $0x62] sm:$0xff]  ;;  %v7122_v54 = vld [vmem:[%s6873_s11 + $0x6a] sm:$0xff]  ;;  %v7125_v55 = vld [vmem:[%s6873_s11 + $0x7a] sm:$0xff] }
  0x29   : > { %5913 = vmatmul.mubr.msk.f32.gmra.mrb[6].mxu1 %vm305_vm1, %v6980_v25  ;;  %v7132_v56 = vld [vmem:[%s6873_s11 + $0x82] sm:$0xff]  ;;  %v7135_v57 = vld [vmem:[%s6873_s11 + $0x92] sm:$0xff]  ;;  %v7142_v58 = vld [vmem:[%s6873_s11 + $0x9a] sm:$0xff] }
  0x2a   : > { %5939 = vmatmul.mubr.msk.f32.gmra.mrb[4].mxu0 %vm305_vm1, %v6915_v12  ;;  %5915 = vmatprep.mubr.msk.f32.mxu1 %vm305_vm1, %v6986_v27  ;;  %v7145_v59 = vld [vmem:[%s6873_s11 + $0xaa] sm:$0xff]  ;;  %v7152_v60 = vld [vmem:[%s6873_s11 + $0xb2] sm:$0xff]  ;;  %v7155_v61 = vld [vmem:[%s6873_s11 + $0xc2] sm:$0xff] }
  0x2b   : > { %5941 = vmatprep.mubr.msk.f32.mxu0 %vm305_vm1, %v6923_v14  ;;  %v7162_v62 = vld [vmem:[%s6873_s11 + $0xca] sm:$0xff]  ;;  %v7165_v63 = vld [vmem:[%s6873_s11 + $0xda] sm:$0xff]  ;;  %v7172_v0 = vld [vmem:[%s6873_s11 + $0xe2] sm:$0xff] }
  0x2c   : > { %v5243_v1 = vld [vmem:[%s8098_s1 + $0x14] sm:$0xf]  ;;  %v7223_v3 = vld [vmem:[%s6873_s11 + $0xf8] sm:$0xff] }
  0x2d   : > { %5916 = vmatmul.mubr.msk.f32.gmra.mrb[8].mxu1 %vm305_vm1, %v7000_v29  ;;  %v7216_v2 = vld [vmem:[%s6873_s11 + $0xf0] sm:$0xff]  ;;  %v5285_v4 = vld [vmem:[%s8098_s1 + $0x18] sm:$0xf] }
  0x2e   : > { %5942 = vmatmul.mubr.msk.f32.gmra.mrb[6].mxu0 %vm305_vm1, %v6937_v16  ;;  %5918 = vmatprep.mubr.msk.f32.mxu1 %vm305_vm1, %v7006_v31  ;;  %v7267_v5 = vld [vmem:[%s6873_s11 + $0xf1] sm:$0xff]  ;;  %v7274_v6 = vld [vmem:[%s6873_s11 + $0xf9] sm:$0xff] }
  0x2f   : > { %5944 = vmatprep.mubr.msk.f32.mxu0 %vm305_vm1, %v6943_v18 }
  0x31   : > { %5919 = vmatmul.mubr.msk.f32.gmra.mrb[10].mxu1 %vm305_vm1, %v7020_v33 }
  0x32   : > { %5945 = vmatmul.mubr.msk.f32.gmra.mrb[8].mxu0 %vm305_vm1, %v6957_v20  ;;  %5921 = vmatprep.mubr.msk.f32.mxu1 %vm305_vm1, %v7026_v35 }
  0x33   : > { %5947 = vmatprep.mubr.msk.f32.mxu0 %vm305_vm1, %v6963_v22 }
  0x35   : > { %5922 = vmatmul.mubr.msk.f32.gmra.mrb[12].mxu1 %vm305_vm1, %v7040_v37 }
  0x36   : > { %5948 = vmatmul.mubr.msk.f32.gmra.mrb[10].mxu0 %vm305_vm1, %v6977_v24  ;;  %5924 = vmatprep.mubr.msk.f32.mxu1 %vm305_vm1, %v7046_v39 }
  0x37   : > { %5950 = vmatprep.mubr.msk.f32.mxu0 %vm305_vm1, %v6983_v26 }
  0x39   : > { %5925 = vmatmul.mubr.msk.f32.gmra.mrb[14].mxu1 %vm305_vm1, %v7060_v41 }
  0x3a   : > { %5951 = vmatmul.mubr.msk.f32.gmra.mrb[12].mxu0 %vm305_vm1, %v6997_v28  ;;  %5927 = vmatprep.mubr.msk.f32.mxu1 %vm305_vm1, %v7064_v43 }
  0x3b   : > { %5953 = vmatprep.mubr.msk.f32.mxu0 %vm305_vm1, %v7003_v30 }
  0x3d   : > { %5928 = vmatmul.mubr.msk.f32.gmra.mrb[16].mxu1 %vm305_vm1, %v7075_v45 }
  0x3e   : > { %5954 = vmatmul.mubr.msk.f32.gmra.mrb[14].mxu0 %vm305_vm1, %v7017_v32 }
  0x3f   : > { %5956 = vmatprep.mubr.msk.f32.mxu0 %vm305_vm1, %v7023_v34 }
  0x42   : > { %5957 = vmatmul.mubr.msk.f32.gmra.mrb[16].mxu0 %vm305_vm1, %v7037_v36 }
  0x43   : > { %5959 = vmatprep.mubr.msk.f32.mxu0 %vm305_vm1, %v7043_v38 }
  0x46   : > { %5960 = vmatmul.mubr.msk.f32.gmra.mrb[18].mxu0 %vm305_vm1, %v7057_v40 }
  0x47   : > { %5964 = vmatprep.mubr.msk.f32.mxu0 %vm305_vm1, %v763_v42 }
  0x4a   : > { %5965 = vmatmul.mubr.msk.f32.vlgmr.msra.gmra.mrb[0].mxu0 %vm305_vm1, %v764_v44 }
  0x4b   : > { %5995 = vmatpush3.msk.msra.mxu0 %vm366_vm0, %v6893_v8  ;;  %5967 = vmatprep.mubr.msk.f32.mxu0 %vm305_vm1, %v7078_v46  ;;  %v7318_v8 = vld [vmem:[%s6873_s11 + $0xf2] sm:$0xff] }
  0x4c   : > { %6026 = vmatprep.subr.msk.mxu0 %vm366_vm0, %v5201_v47 }
  0x4e   : > { %5968 = vmatmul.mubr.msk.f32.gmra.mrb[2].mxu0 %vm305_vm1, %v7091_v48 }
  0x4f   : > { %5970 = vmatprep.mubr.msk.f32.mxu0 %vm305_vm1, %v7094_v49 }
  0x52   : > { %5971 = vmatmul.mubr.msk.f32.gmra.mrb[4].mxu0 %vm305_vm1, %v7102_v50 }
  0x53   : > { %5973 = vmatprep.mubr.msk.f32.mxu0 %vm305_vm1, %v7105_v51 }
  0x56   : > { %5974 = vmatmul.mubr.msk.f32.gmra.mrb[6].mxu0 %vm305_vm1, %v7112_v52 }
  0x57   : > { %5976 = vmatprep.mubr.msk.f32.mxu0 %vm305_vm1, %v7115_v53 }
  0x5a   : > { %5977 = vmatmul.mubr.msk.f32.gmra.mrb[8].mxu0 %vm305_vm1, %v7122_v54 }
  0x5b   : > { %5979 = vmatprep.mubr.msk.f32.mxu0 %vm305_vm1, %v7125_v55 }
  0x5e   : > { %5980 = vmatmul.mubr.msk.f32.gmra.mrb[10].mxu0 %vm305_vm1, %v7132_v56 }
  0x5f   : > { %5982 = vmatprep.mubr.msk.f32.mxu0 %vm305_vm1, %v7135_v57 }
  0x62   : > { %5983 = vmatmul.mubr.msk.f32.gmra.mrb[12].mxu0 %vm305_vm1, %v7142_v58 }
  0x63   : > { %5985 = vmatprep.mubr.msk.f32.mxu0 %vm305_vm1, %v7145_v59 }
  0x66   : > { %5986 = vmatmul.mubr.msk.f32.gmra.mrb[14].mxu0 %vm305_vm1, %v7152_v60 }
  0x67   : > { %5988 = vmatprep.mubr.msk.f32.mxu0 %vm305_vm1, %v7155_v61 }
  0x6a   : > { %5989 = vmatmul.mubr.msk.f32.gmra.mrb[16].mxu0 %vm305_vm1, %v7162_v62 }
  0x6b   : > { %5991 = vmatprep.mubr.msk.f32.mxu0 %vm305_vm1, %v7165_v63 }
  0x6e   : > { %5992 = vmatmul.mubr.msk.f32.gmra.mrb[18].mxu0 %vm305_vm1, %v7172_v0 }
  0x6f   : > { %5996 = vmatprep.mubr.msk.f32.mxu0 %vm305_vm1, %v6888_v7  ;;  %v5327_v7 = vld [vmem:[%s8098_s1 + $0x1c] sm:$0xf] }
  0x72   : > { %5997 = vmatmul.mubr.msk.f32.vlgmr.msra.gmra.mrb[0].mxu0 %vm305_vm1, %v6900_v9  ;;  %v7325_v9 = vld [vmem:[%s6873_s11 + $0xfa] sm:$0xff] }
  0x73   : > { %6027 = vmatpush3.msk.msra.mxu0 %vm366_vm0, %v5201_v47  ;;  %5999 = vmatprep.mubr.msk.f32.mxu0 %vm305_vm1, %v6903_v10 }
  0x74   : > { %6058 = vmatprep.subr.msk.mxu0 %vm366_vm0, %v5243_v1 }
  0x76   : > { %6000 = vmatmul.mubr.msk.f32.gmra.mrb[2].mxu0 %vm305_vm1, %v6915_v12 }
  0x77   : > { %6002 = vmatprep.mubr.msk.f32.mxu0 %vm305_vm1, %v6923_v14 }
  0x7a   : > { %6003 = vmatmul.mubr.msk.f32.gmra.mrb[4].mxu0 %vm305_vm1, %v6937_v16 }
  0x7b   : > { %6005 = vmatprep.mubr.msk.f32.mxu0 %vm305_vm1, %v6943_v18 }
  0x7e   : > { %6006 = vmatmul.mubr.msk.f32.gmra.mrb[6].mxu0 %vm305_vm1, %v6957_v20 }
  0x7f   : > { %6008 = vmatprep.mubr.msk.f32.mxu0 %vm305_vm1, %v6963_v22 }
  0x82   : > { %6009 = vmatmul.mubr.msk.f32.gmra.mrb[8].mxu0 %vm305_vm1, %v6977_v24 }
  0x83   : > { %6011 = vmatprep.mubr.msk.f32.mxu0 %vm305_vm1, %v6983_v26 }
  0x86   : > { %6012 = vmatmul.mubr.msk.f32.gmra.mrb[10].mxu0 %vm305_vm1, %v6997_v28 }
  0x87   : > { %6014 = vmatprep.mubr.msk.f32.mxu0 %vm305_vm1, %v7003_v30 }
  0x8a   : > { %6015 = vmatmul.mubr.msk.f32.gmra.mrb[12].mxu0 %vm305_vm1, %v7017_v32 }
  0x8b   : > { %6017 = vmatprep.mubr.msk.f32.mxu0 %vm305_vm1, %v7023_v34 }
  0x8e   : > { %6018 = vmatmul.mubr.msk.f32.gmra.mrb[14].mxu0 %vm305_vm1, %v7037_v36 }
  0x8f   : > { %6020 = vmatprep.mubr.msk.f32.mxu0 %vm305_vm1, %v7043_v38 }
  0x92   : > { %6021 = vmatmul.mubr.msk.f32.gmra.mrb[16].mxu0 %vm305_vm1, %v7057_v40 }
  0x93   : > { %6023 = vmatprep.mubr.msk.f32.mxu0 %vm305_vm1, %v7216_v2 }
  0x96   : > { %6024 = vmatmul.mubr.msk.f32.gmra.mrb[18].mxu0 %vm305_vm1, %v7223_v3 }
  0x97   : > { %6028 = vmatprep.mubr.msk.f32.mxu0 %vm305_vm1, %v6910_v11  ;;  %v5369_v11 = vld [vmem:[%s8098_s1 + $0x20] sm:$0xf] }
  0x9a   : > { %6029 = vmatmul.mubr.msk.f32.vlgmr.msra.gmra.mrb[0].mxu0 %vm305_vm1, %v6918_v13  ;;  %v5325_v13 = vld [vmem:[%s6873_s11 + $0x109] sm:$0xff] }
  0x9b   : > { %6059 = vmatpush3.msk.msra.mxu0 %vm366_vm0, %v5243_v1  ;;  %6031 = vmatprep.mubr.msk.f32.mxu0 %vm305_vm1, %v6926_v15 }
  0x9c   : > { %6090 = vmatprep.subr.msk.mxu0 %vm366_vm0, %v5285_v4 }
  0x9e   : > { %6032 = vmatmul.mubr.msk.f32.gmra.mrb[2].mxu0 %vm305_vm1, %v6940_v17 }
  0x9f   : > { %6034 = vmatprep.mubr.msk.f32.mxu0 %vm305_vm1, %v6946_v19 }
  0xa2   : > { %6035 = vmatmul.mubr.msk.f32.gmra.mrb[4].mxu0 %vm305_vm1, %v6960_v21 }
  0xa3   : > { %6037 = vmatprep.mubr.msk.f32.mxu0 %vm305_vm1, %v6966_v23 }
  0xa6   : > { %6038 = vmatmul.mubr.msk.f32.gmra.mrb[6].mxu0 %vm305_vm1, %v6980_v25 }
  0xa7   : > { %6040 = vmatprep.mubr.msk.f32.mxu0 %vm305_vm1, %v6986_v27 }
  0xaa   : > { %6041 = vmatmul.mubr.msk.f32.gmra.mrb[8].mxu0 %vm305_vm1, %v7000_v29 }
  0xab   : > { %6043 = vmatprep.mubr.msk.f32.mxu0 %vm305_vm1, %v7006_v31 }
  0xae   : > { %6044 = vmatmul.mubr.msk.f32.gmra.mrb[10].mxu0 %vm305_vm1, %v7020_v33 }
  0xaf   : > { %6046 = vmatprep.mubr.msk.f32.mxu0 %vm305_vm1, %v7026_v35 }
  0xb2   : > { %6047 = vmatmul.mubr.msk.f32.gmra.mrb[12].mxu0 %vm305_vm1, %v7040_v37 }
  0xb3   : > { %6049 = vmatprep.mubr.msk.f32.mxu0 %vm305_vm1, %v7046_v39 }
  0xb6   : > { %6050 = vmatmul.mubr.msk.f32.gmra.mrb[14].mxu0 %vm305_vm1, %v7060_v41 }
  0xb7   : > { %6052 = vmatprep.mubr.msk.f32.mxu0 %vm305_vm1, %v7064_v43 }
  0xba   : > { %6053 = vmatmul.mubr.msk.f32.gmra.mrb[16].mxu0 %vm305_vm1, %v7075_v45 }
  0xbb   : > { %6055 = vmatprep.mubr.msk.f32.mxu0 %vm305_vm1, %v7267_v5 }
  0xbe   : > { %6056 = vmatmul.mubr.msk.f32.gmra.mrb[18].mxu0 %vm305_vm1, %v7274_v6 }
  0xbf   : > { %6060 = vmatprep.mubr.msk.f32.mxu0 %vm305_vm1, %v7078_v46 }
  0xc2   : > { %6061 = vmatmul.mubr.msk.f32.vlgmr.msra.gmra.mrb[0].mxu0 %vm305_vm1, %v7091_v48 }
  0xc3   : > { %6091 = vmatpush3.msk.msra.mxu0 %vm366_vm0, %v5285_v4  ;;  %6063 = vmatprep.mubr.msk.f32.mxu0 %vm305_vm1, %v7094_v49 }
  0xc4   : > { %6122 = vmatprep.subr.msk.mxu0 %vm366_vm0, %v5327_v7 }
  0xc6   : > { %6064 = vmatmul.mubr.msk.f32.gmra.mrb[2].mxu0 %vm305_vm1, %v7102_v50 }
  0xc7   : > { %6066 = vmatprep.mubr.msk.f32.mxu0 %vm305_vm1, %v7105_v51 }
  0xca   : > { %6067 = vmatmul.mubr.msk.f32.gmra.mrb[4].mxu0 %vm305_vm1, %v7112_v52 }
  0xcb   : > { %6069 = vmatprep.mubr.msk.f32.mxu0 %vm305_vm1, %v7115_v53 }
  0xce   : > { %6070 = vmatmul.mubr.msk.f32.gmra.mrb[6].mxu0 %vm305_vm1, %v7122_v54 }
  0xcf   : > { %6072 = vmatprep.mubr.msk.f32.mxu0 %vm305_vm1, %v7125_v55 }
  0xd2   : > { %6073 = vmatmul.mubr.msk.f32.gmra.mrb[8].mxu0 %vm305_vm1, %v7132_v56 }
  0xd3   : > { %6075 = vmatprep.mubr.msk.f32.mxu0 %vm305_vm1, %v7135_v57 }
  0xd6   : > { %6076 = vmatmul.mubr.msk.f32.gmra.mrb[10].mxu0 %vm305_vm1, %v7142_v58 }
  0xd7   : > { %6078 = vmatprep.mubr.msk.f32.mxu0 %vm305_vm1, %v7145_v59 }
  0xda   : > { %6079 = vmatmul.mubr.msk.f32.gmra.mrb[12].mxu0 %vm305_vm1, %v7152_v60 }
  0xdb   : > { %6081 = vmatprep.mubr.msk.f32.mxu0 %vm305_vm1, %v7155_v61 }
  0xde   : > { %6082 = vmatmul.mubr.msk.f32.gmra.mrb[14].mxu0 %vm305_vm1, %v7162_v62 }
  0xdf   : > { %6084 = vmatprep.mubr.msk.f32.mxu0 %vm305_vm1, %v7165_v63 }
  0xe2   : > { %6085 = vmatmul.mubr.msk.f32.gmra.mrb[16].mxu0 %vm305_vm1, %v7172_v0 }
  0xe3   : > { %6087 = vmatprep.mubr.msk.f32.mxu0 %vm305_vm1, %v7318_v8 }
  0xe6   : > { %6088 = vmatmul.mubr.msk.f32.gmra.mrb[18].mxu0 %vm305_vm1, %v7325_v9 }
  0xe7   : > { %6092 = vmatprep.mubr.msk.f32.mxu0 %vm305_vm1, %v6903_v10  ;;  %v5283_v10 = vld [vmem:[%s6873_s11 + $0x108] sm:$0xff] }
  0xea   : > { %6093 = vmatmul.mubr.msk.f32.vlgmr.msra.gmra.mrb[0].mxu0 %vm305_vm1, %v6915_v12  ;;  %v5284_v12 = vld [vmem:[%s6873_s11 + $0x110] sm:$0xff] }
  0xeb   : > { %6123 = vmatpush3.msk.msra.mxu0 %vm366_vm0, %v5327_v7  ;;  %6095 = vmatprep.mubr.msk.f32.mxu0 %vm305_vm1, %v6923_v14  ;;  %v5326_v14 = vld [vmem:[%s6873_s11 + $0x111] sm:$0xff] }
  0xec   : > { %6154 = vmatprep.subr.msk.mxu0 %vm366_vm0, %v5369_v11 }
  0xee   : > { %6096 = vmatmul.mubr.msk.f32.gmra.mrb[2].mxu0 %vm305_vm1, %v6937_v16  ;;  %v5368_v16 = vld [vmem:[%s6873_s11 + $0x112] sm:$0xff] }
  0xef   : > { %6098 = vmatprep.mubr.msk.f32.mxu0 %vm305_vm1, %v6943_v18 }
  0xf2   : > { %6099 = vmatmul.mubr.msk.f32.gmra.mrb[4].mxu0 %vm305_vm1, %v6957_v20 }
  0xf3   : > { %6101 = vmatprep.mubr.msk.f32.mxu0 %vm305_vm1, %v6963_v22 }
  0xf6   : > { %6102 = vmatmul.mubr.msk.f32.gmra.mrb[6].mxu0 %vm305_vm1, %v6977_v24 }
  0xf7   : > { %6104 = vmatprep.mubr.msk.f32.mxu0 %vm305_vm1, %v6983_v26 }
  0xfa   : > { %6105 = vmatmul.mubr.msk.f32.gmra.mrb[8].mxu0 %vm305_vm1, %v6997_v28 }
  0xfb   : > { %6107 = vmatprep.mubr.msk.f32.mxu0 %vm305_vm1, %v7003_v30 }
  0xfe   : > { %6108 = vmatmul.mubr.msk.f32.gmra.mrb[10].mxu0 %vm305_vm1, %v7017_v32 }
  0xff   : > { %6110 = vmatprep.mubr.msk.f32.mxu0 %vm305_vm1, %v7023_v34 }
 0x102   : > { %6111 = vmatmul.mubr.msk.f32.gmra.mrb[12].mxu0 %vm305_vm1, %v7037_v36  ;;  %v7487_v36 = vld [vmem:[%s8100_s3] sm:$0xff] }
 0x103   : > { %6113 = vmatprep.mubr.msk.f32.mxu0 %vm305_vm1, %v7043_v38 }
 0x106   : > { %6114 = vmatmul.mubr.msk.f32.gmra.mrb[14].mxu0 %vm305_vm1, %v7057_v40 }
 0x107   : > { %6116 = vmatprep.mubr.msk.f32.mxu0 %vm305_vm1, %v7216_v2 }
 0x10a   : > { %6117 = vmatmul.mubr.msk.f32.gmra.mrb[16].mxu0 %vm305_vm1, %v7223_v3 }
 0x10b   : > { %6119 = vmatprep.mubr.msk.f32.mxu0 %vm305_vm1, %v5283_v10 }
 0x10e   : > { %6120 = vmatmul.mubr.msk.f32.gmra.mrb[18].mxu0 %vm305_vm1, %v5284_v12 }
 0x10f   : > { %6124 = vmatprep.mubr.msk.f32.mxu0 %vm305_vm1, %v6926_v15  ;;  %v5367_v15 = vld [vmem:[%s6873_s11 + $0x10a] sm:$0xff] }
 0x112   : > { %6125 = vmatmul.mubr.msk.f32.vlgmr.msra.gmra.mrb[0].mxu0 %vm305_vm1, %v6940_v17  ;;  %v5905_v17 = vpop.f32.mrb[0].mxu1 }
 0x113   : > { %6155 = vmatpush3.msk.msra.mxu0 %vm366_vm0, %v5369_v11  ;;  %6127 = vmatprep.mubr.msk.f32.mxu0 %vm305_vm1, %v6946_v19  ;;  %v446_v18 = vpop.f32.mrb[1].mxu1 }
 0x114   : > { %v5908_v19 = vpop.f32.mrb[2].mxu1 }
 0x115   : > { %v456_v20 = vpop.f32.mrb[3].mxu1 }
 0x116   : > { %6128 = vmatmul.mubr.msk.f32.gmra.mrb[2].mxu0 %vm305_vm1, %v6960_v21  ;;  %v5911_v21 = vpop.f32.mrb[4].mxu1 }
 0x117   : > { %6130 = vmatprep.mubr.msk.f32.mxu0 %vm305_vm1, %v6966_v23  ;;  %v7455_v22 = vpop.f32.mrb[5].mxu1 }
 0x118   : > { %v7457_v23 = vpop.f32.mrb[6].mxu1 }
 0x119   : > { %v7459_v24 = vpop.f32.mrb[7].mxu1 }
 0x11a   : > { %6131 = vmatmul.mubr.msk.f32.gmra.mrb[4].mxu0 %vm305_vm1, %v6980_v25  ;;  %v7461_v25 = vpop.f32.mrb[8].mxu1 }
 0x11b   : > { %6133 = vmatprep.mubr.msk.f32.mxu0 %vm305_vm1, %v6986_v27  ;;  %v7463_v26 = vpop.f32.mrb[9].mxu1 }
 0x11c   : > { %v7465_v27 = vpop.f32.mrb[10].mxu1 }
 0x11d   : > { %v7467_v28 = vpop.f32.mrb[11].mxu1 }
 0x11e   : > { %6134 = vmatmul.mubr.msk.f32.gmra.mrb[6].mxu0 %vm305_vm1, %v7000_v29  ;;  %v7469_v29 = vpop.f32.mrb[12].mxu1 }
 0x11f   : > { %6136 = vmatprep.mubr.msk.f32.mxu0 %vm305_vm1, %v7006_v31  ;;  %v7471_v30 = vpop.f32.mrb[13].mxu1 }
 0x120   : > { %v7473_v31 = vpop.f32.mrb[14].mxu1 }
 0x121   : > { %v7475_v32 = vpop.f32.mrb[15].mxu1 }
 0x122   : > { %6137 = vmatmul.mubr.msk.f32.gmra.mrb[8].mxu0 %vm305_vm1, %v7020_v33  ;;  %v5399_v33 = vld [vmem:[%s8100_s3 + $0x8] sm:$0xff]  ;;  %v7480_v34 = vpop.f32.mrb[16].mxu1 }
 0x123   : > { %6139 = vmatprep.mubr.msk.f32.mxu0 %vm305_vm1, %v7026_v35  ;;  %6186 = vmatprep.subr.mxu1 %v5399_v33  ;;  %v7482_v35 = vpop.f32.mrb[17].mxu1 }
 0x124   : > { %6187 = vmatpush3.msra.mxu1 %v5399_v33 }
 0x125   : > { %6212 = vmatprep.subr.mxu1 %v7487_v36 }
 0x126   : > { %6140 = vmatmul.mubr.msk.f32.gmra.mrb[10].mxu0 %vm305_vm1, %v7040_v37  ;;  %v7493_v37 = vld [vmem:[%s8099_s2] ss:$0 sm:$0xff] }
 0x127   : > { %6142 = vmatprep.mubr.msk.f32.mxu0 %vm305_vm1, %v7046_v39 }
 0x12a   : > { %6143 = vmatmul.mubr.msk.f32.gmra.mrb[12].mxu0 %vm305_vm1, %v7060_v41 }
 0x12b   : > { %6145 = vmatprep.mubr.msk.f32.mxu0 %vm305_vm1, %v7064_v43 }
 0x12e   : > { %6146 = vmatmul.mubr.msk.f32.gmra.mrb[14].mxu0 %vm305_vm1, %v7075_v45 }
 0x12f   : > { %6148 = vmatprep.mubr.msk.f32.mxu0 %vm305_vm1, %v7267_v5 }
 0x132   : > { %6149 = vmatmul.mubr.msk.f32.gmra.mrb[16].mxu0 %vm305_vm1, %v7274_v6 }
 0x133   : > { %6151 = vmatprep.mubr.msk.f32.mxu0 %vm305_vm1, %v5325_v13 }
 0x136   : > { %6152 = vmatmul.mubr.msk.f32.gmra.mrb[18].mxu0 %vm305_vm1, %v5326_v14 }
 0x137   : > { %6156 = vmatprep.mubr.msk.f32.mxu0 %vm305_vm1, %v7094_v49 }
 0x13a   : > { %6157 = vmatmul.mubr.msk.f32.vlgmr.msra.gmra.mrb[0].mxu0 %vm305_vm1, %v7102_v50 }
 0x13b   : > { %6159 = vmatprep.mubr.msk.f32.mxu0 %vm305_vm1, %v7105_v51 }
 0x13e   : > { %6160 = vmatmul.mubr.msk.f32.gmra.mrb[2].mxu0 %vm305_vm1, %v7112_v52 }
 0x13f   : > { %6162 = vmatprep.mubr.msk.f32.mxu0 %vm305_vm1, %v7115_v53 }
 0x142   : > { %6163 = vmatmul.mubr.msk.f32.gmra.mrb[4].mxu0 %vm305_vm1, %v7122_v54 }
 0x143   : > { %6165 = vmatprep.mubr.msk.f32.mxu0 %vm305_vm1, %v7125_v55 }
 0x146   : > { %6166 = vmatmul.mubr.msk.f32.gmra.mrb[6].mxu0 %vm305_vm1, %v7132_v56 }
 0x147   : > { %6168 = vmatprep.mubr.msk.f32.mxu0 %vm305_vm1, %v7135_v57 }
 0x14a   : > { %6169 = vmatmul.mubr.msk.f32.gmra.mrb[8].mxu0 %vm305_vm1, %v7142_v58 }
 0x14b   : > { %6171 = vmatprep.mubr.msk.f32.mxu0 %vm305_vm1, %v7145_v59 }
 0x14e   : > { %6172 = vmatmul.mubr.msk.f32.gmra.mrb[10].mxu0 %vm305_vm1, %v7152_v60 }
 0x14f   : > { %6174 = vmatprep.mubr.msk.f32.mxu0 %vm305_vm1, %v7155_v61 }
 0x152   : > { %6175 = vmatmul.mubr.msk.f32.gmra.mrb[12].mxu0 %vm305_vm1, %v7162_v62 }
 0x153   : > { %6177 = vmatprep.mubr.msk.f32.mxu0 %vm305_vm1, %v7165_v63 }
 0x156   : > { %6178 = vmatmul.mubr.msk.f32.gmra.mrb[14].mxu0 %vm305_vm1, %v7172_v0 }
 0x157   : > { %6180 = vmatprep.mubr.msk.f32.mxu0 %vm305_vm1, %v7318_v8 }
 0x15a   : > { %6181 = vmatmul.mubr.msk.f32.gmra.mrb[16].mxu0 %vm305_vm1, %v7325_v9 }
 0x15b   : > { %6183 = vmatprep.mubr.msk.f32.mxu0 %vm305_vm1, %v5367_v15 }
 0x15e   : > { %6184 = vmatmul.mubr.msk.f32.gmra.mrb[18].mxu0 %vm305_vm1, %v5368_v16 }
 0x20d   : > { %v6158_v38 = vpop.f32.mrb[0].mxu0 }
 0x20e   : > { %v2663_v39 = vadd.f32 %v6158_v38, %v7493_v37  ;;  %v2536_v40 = vpop.f32.mrb[1].mxu0 }
 0x20f   : > { %v2662_v41 = vadd.f32 %v7493_v37, %v2536_v40 }
 0x210   : > { %vm2683_vm2 = vcmp.gt.f32.partialorder %v2663_v39, 0.0  ;;  %v2703_v42 = vmul.f32 0.01, %v2663_v39 }
 0x211   : > { %vm2682_vm5 = vcmp.gt.f32.partialorder %v2662_v41, 0.0  ;;  %v2702_v43 = vmul.f32 0.01, %v2662_v41  ;;  %v6161_v44 = vpop.f32.mrb[2].mxu0 }
 0x212   : > { %v2723_v45 = vsel %vm2683_vm2, %v2663_v39, %v2703_v42  ;;  %v6422_v46 = vadd.f32 %v6161_v44, %v5905_v17  ;;  %v2546_v47 = vpop.f32.mrb[3].mxu0 }
 0x213   : > { %2744 = vst.msk [vmem:[#allocation2 + $0x9] sm:$0xff] %vm2742_vm3, %v2723_v45  ;;  %v2722_v48 = vsel %vm2682_vm5, %v2662_v41, %v2702_v43  ;;  %v6423_v49 = vadd.f32 %v2546_v47, %v446_v18 }
 0x214   : > { %2775 = vst.msk [vmem:[#allocation2 + $0xb] sm:$0x40] %vm2774_vm4, %v2723_v45  ;;  %v2665_v50 = vadd.f32 %v6422_v46, %v7493_v37 }
 0x215   : > { %2743 = vst.msk [vmem:[#allocation2 + $0x1] sm:$0xff] %vm2742_vm3, %v2722_v48  ;;  %v2664_v51 = vadd.f32 %v6423_v49, %v7493_v37  ;;  %v6164_v52 = vpop.f32.mrb[4].mxu0 }
 0x216   : > { %2764 = vst.msk [vmem:[#allocation2 - $0x1] sm:$0x2] %vm2763_vm6, %v2722_v48  ;;  %vm2685_vm7 = vcmp.gt.f32.partialorder %v2665_v50, 0.0  ;;  %v2705_v53 = vmul.f32 0.01, %v2665_v50  ;;  %v6424_v54 = vadd.f32 %v6164_v52, %v5908_v19  ;;  %v2556_v55 = vpop.f32.mrb[5].mxu0 }
 0x217   : > { %vm2684_vm8 = vcmp.gt.f32.partialorder %v2664_v51, 0.0  ;;  %v2704_v56 = vmul.f32 0.01, %v2664_v51  ;;  %v6425_v57 = vadd.f32 %v2556_v55, %v456_v20 }
 0x218   : > { %v2725_v58 = vsel %vm2685_vm7, %v2665_v50, %v2705_v53  ;;  %v2667_v59 = vadd.f32 %v6424_v54, %v7493_v37 }
 0x219   : > { %2746 = vst.msk [vmem:[#allocation2 + $0x21] sm:$0xff] %vm2742_vm3, %v2725_v58  ;;  %v2724_v60 = vsel %vm2684_vm8, %v2664_v51, %v2704_v56  ;;  %v2666_v61 = vadd.f32 %v6425_v57, %v7493_v37  ;;  %v6167_v62 = vpop.f32.mrb[6].mxu0 }
 0x21a   : > { %2776 = vst.msk [vmem:[#allocation2 + $0x23] sm:$0x40] %vm2774_vm4, %v2725_v58  ;;  %vm2687_vm9 = vcmp.gt.f32.partialorder %v2667_v59, 0.0  ;;  %v2707_v63 = vmul.f32 0.01, %v2667_v59  ;;  %v6426_v0 = vadd.f32 %v6167_v62, %v5911_v21  ;;  %v2566_v1 = vpop.f32.mrb[7].mxu0 }
 0x21b   : > { %2745 = vst.msk [vmem:[#allocation2 + $0x19] sm:$0xff] %vm2742_vm3, %v2724_v60  ;;  %vm2686_vm10 = vcmp.gt.f32.partialorder %v2666_v61, 0.0  ;;  %v2706_v2 = vmul.f32 0.01, %v2666_v61  ;;  %v6427_v3 = vadd.f32 %v2566_v1, %v7455_v22 }
 0x21c   : > { %2765 = vst.msk [vmem:[#allocation2 + $0x17] sm:$0x2] %vm2763_vm6, %v2724_v60  ;;  %v2727_v4 = vsel %vm2687_vm9, %v2667_v59, %v2707_v63  ;;  %v2669_v5 = vadd.f32 %v6426_v0, %v7493_v37 }
 0x21d   : > { %2748 = vst.msk [vmem:[#allocation2 + $0x39] sm:$0xff] %vm2742_vm3, %v2727_v4  ;;  %v2726_v6 = vsel %vm2686_vm10, %v2666_v61, %v2706_v2  ;;  %v2668_v7 = vadd.f32 %v6427_v3, %v7493_v37  ;;  %v6170_v8 = vpop.f32.mrb[8].mxu0 }
 0x21e   : > { %2777 = vst.msk [vmem:[#allocation2 + $0x3b] sm:$0x40] %vm2774_vm4, %v2727_v4  ;;  %vm2689_vm11 = vcmp.gt.f32.partialorder %v2669_v5, 0.0  ;;  %v2709_v9 = vmul.f32 0.01, %v2669_v5  ;;  %v6428_v11 = vadd.f32 %v6170_v8, %v7457_v23  ;;  %v2576_v10 = vpop.f32.mrb[9].mxu0 }
 0x21f   : > { %2747 = vst.msk [vmem:[#allocation2 + $0x31] sm:$0xff] %vm2742_vm3, %v2726_v6  ;;  %vm2688_vm12 = vcmp.gt.f32.partialorder %v2668_v7, 0.0  ;;  %v2708_v12 = vmul.f32 0.01, %v2668_v7  ;;  %v6429_v13 = vadd.f32 %v2576_v10, %v7459_v24 }
 0x220   : > { %2766 = vst.msk [vmem:[#allocation2 + $0x2f] sm:$0x2] %vm2763_vm6, %v2726_v6  ;;  %v2729_v14 = vsel %vm2689_vm11, %v2669_v5, %v2709_v9  ;;  %v2671_v15 = vadd.f32 %v6428_v11, %v7493_v37 }
 0x221   : > { %2750 = vst.msk [vmem:[#allocation2 + $0x51] sm:$0xff] %vm2742_vm3, %v2729_v14  ;;  %v2728_v16 = vsel %vm2688_vm12, %v2668_v7, %v2708_v12  ;;  %v2670_v17 = vadd.f32 %v6429_v13, %v7493_v37  ;;  %v6173_v18 = vpop.f32.mrb[10].mxu0  ;;  %vm2806_vm12 = vcmask 58368  }
 0x222   : > { %2778 = vst.msk [vmem:[#allocation2 + $0x53] sm:$0x40] %vm2774_vm4, %v2729_v14  ;;  %vm2691_vm13 = vcmp.gt.f32.partialorder %v2671_v15, 0.0  ;;  %v2711_v19 = vmul.f32 0.01, %v2671_v15  ;;  %v6430_v20 = vadd.f32 %v6173_v18, %v7461_v25  ;;  %v2586_v21 = vpop.f32.mrb[11].mxu0 }
 0x223   : > { %2749 = vst.msk [vmem:[#allocation2 + $0x49] sm:$0xff] %vm2742_vm3, %v2728_v16  ;;  %vm2690_vm14 = vcmp.gt.f32.partialorder %v2670_v17, 0.0  ;;  %v2710_v22 = vmul.f32 0.01, %v2670_v17  ;;  %v6431_v23 = vadd.f32 %v2586_v21, %v7463_v26 }
 0x224   : > { %2767 = vst.msk [vmem:[#allocation2 + $0x47] sm:$0x2] %vm2763_vm6, %v2728_v16  ;;  %v2731_v24 = vsel %vm2691_vm13, %v2671_v15, %v2711_v19  ;;  %v2673_v33 = vadd.f32 %v6430_v20, %v7493_v37 }
 0x225   : > { %2752 = vst.msk [vmem:[#allocation2 + $0x69] sm:$0xff] %vm2742_vm3, %v2731_v24  ;;  %v2730_v38 = vsel %vm2690_vm14, %v2670_v17, %v2710_v22  ;;  %v2672_v39 = vadd.f32 %v6431_v23, %v7493_v37  ;;  %v6176_v40 = vpop.f32.mrb[12].mxu0 }
 0x226   : > { %2779 = vst.msk [vmem:[#allocation2 + $0x6b] sm:$0x40] %vm2774_vm4, %v2731_v24  ;;  %vm2693_vm15 = vcmp.gt.f32.partialorder %v2673_v33, 0.0  ;;  %v2713_v25 = vmul.f32 0.01, %v2673_v33  ;;  %v6432_v26 = vadd.f32 %v6176_v40, %v7465_v27  ;;  %v2596_v41 = vpop.f32.mrb[13].mxu0 }
 0x227   : > { %2751 = vst.msk [vmem:[#allocation2 + $0x61] sm:$0xff] %vm2742_vm3, %v2730_v38  ;;  %vm2692_vm0 = vcmp.gt.f32.partialorder %v2672_v39, 0.0  ;;  %v2712_v42 = vmul.f32 0.01, %v2672_v39  ;;  %v6433_v43 = vadd.f32 %v2596_v41, %v7467_v28 }
 0x228   : > { %2768 = vst.msk [vmem:[#allocation2 + $0x5f] sm:$0x2] %vm2763_vm6, %v2730_v38  ;;  %v2733_v44 = vsel %vm2693_vm15, %v2673_v33, %v2713_v25  ;;  %v2675_v45 = vadd.f32 %v6432_v26, %v7493_v37 }
 0x229   : > { %2754 = vst.msk [vmem:[#allocation2 + $0x81] sm:$0xff] %vm2742_vm3, %v2733_v44  ;;  %v2732_v46 = vsel %vm2692_vm0, %v2672_v39, %v2712_v42  ;;  %v2674_v47 = vadd.f32 %v6433_v43, %v7493_v37  ;;  %v6179_v48 = vpop.f32.mrb[14].mxu0 }
 0x22a   : > { %2780 = vst.msk [vmem:[#allocation2 + $0x83] sm:$0x40] %vm2774_vm4, %v2733_v44  ;;  %vm2695_vm1 = vcmp.gt.f32.partialorder %v2675_v45, 0.0  ;;  %v2715_v27 = vmul.f32 0.01, %v2675_v45  ;;  %v6434_v28 = vadd.f32 %v6179_v48, %v7469_v29  ;;  %v2606_v49 = vpop.f32.mrb[15].mxu0 }
 0x22b   : > { %2753 = vst.msk [vmem:[#allocation2 + $0x79] sm:$0xff] %vm2742_vm3, %v2732_v46  ;;  %vm2694_vm2 = vcmp.gt.f32.partialorder %v2674_v47, 0.0  ;;  %v2714_v50 = vmul.f32 0.01, %v2674_v47  ;;  %v6435_v51 = vadd.f32 %v2606_v49, %v7471_v30 }
 0x22c   : > { %2769 = vst.msk [vmem:[#allocation2 + $0x77] sm:$0x2] %vm2763_vm6, %v2732_v46  ;;  %v2735_v52 = vsel %vm2695_vm1, %v2675_v45, %v2715_v27  ;;  %v2677_v53 = vadd.f32 %v6434_v28, %v7493_v37  ;;  %v5432_v45 = vld [vmem:[%s8100_s3 + $0x10] sm:$0xff] }
 0x22d   : > { %2756 = vst.msk [vmem:[#allocation2 + $0x99] sm:$0xff] %vm2742_vm3, %v2735_v52  ;;  %v2734_v54 = vsel %vm2694_vm2, %v2674_v47, %v2714_v50  ;;  %v2676_v55 = vadd.f32 %v6435_v51, %v7493_v37  ;;  %v6182_v56 = vpop.f32.mrb[16].mxu0 }
 0x22e   : > { %2781 = vst.msk [vmem:[#allocation2 + $0x9b] sm:$0x40] %vm2774_vm4, %v2735_v52  ;;  %vm2697_vm5 = vcmp.gt.f32.partialorder %v2677_v53, 0.0  ;;  %v2717_v29 = vmul.f32 0.01, %v2677_v53  ;;  %v6436_v30 = vadd.f32 %v6182_v56, %v7473_v31  ;;  %v2616_v57 = vpop.f32.mrb[17].mxu0 }
 0x22f   : > { %2755 = vst.msk [vmem:[#allocation2 + $0x91] sm:$0xff] %vm2742_vm3, %v2734_v54  ;;  %vm2696_vm7 = vcmp.gt.f32.partialorder %v2676_v55, 0.0  ;;  %v2716_v58 = vmul.f32 0.01, %v2676_v55  ;;  %v6437_v59 = vadd.f32 %v2616_v57, %v7475_v32 }
 0x230   : > { %2770 = vst.msk [vmem:[#allocation2 + $0x8f] sm:$0x2] %vm2763_vm6, %v2734_v54  ;;  %v2737_v60 = vsel %vm2697_vm5, %v2677_v53, %v2717_v29  ;;  %v2679_v61 = vadd.f32 %v6436_v30, %v7493_v37 }
 0x231   : > { %2758 = vst.msk [vmem:[#allocation2 + $0xb1] sm:$0xff] %vm2742_vm3, %v2737_v60  ;;  %v2736_v62 = vsel %vm2696_vm7, %v2676_v55, %v2716_v58  ;;  %v2678_v31 = vadd.f32 %v6437_v59, %v7493_v37  ;;  %v6185_v63 = vpop.f32.mrb[18].mxu0 }
 0x232   : > { %2782 = vst.msk [vmem:[#allocation2 + $0xb3] sm:$0x40] %vm2774_vm4, %v2737_v60  ;;  %vm2699_vm8 = vcmp.gt.f32.partialorder %v2679_v61, 0.0  ;;  %v2719_v32 = vmul.f32 0.01, %v2679_v61  ;;  %v6438_v0 = vadd.f32 %v6185_v63, %v7480_v34  ;;  %v2626_v1 = vpop.f32.mrb[19].mxu0 }
 0x233   : > { %2757 = vst.msk [vmem:[#allocation2 + $0xa9] sm:$0xff] %vm2742_vm3, %v2736_v62  ;;  %vm2698_vm9 = vcmp.gt.f32.partialorder %v2678_v31, 0.0  ;;  %v2718_v2 = vmul.f32 0.01, %v2678_v31  ;;  %v6439_v3 = vadd.f32 %v2626_v1, %v7482_v35 }
 0x234   : > { %2771 = vst.msk [vmem:[#allocation2 + $0xa7] sm:$0x2] %vm2763_vm6, %v2736_v62  ;;  %v2739_v4 = vsel %vm2699_vm8, %v2679_v61, %v2719_v32  ;;  %v2681_v5 = vadd.f32 %v6438_v0, %v7493_v37 }
 0x235   : > { %2760 = vst.msk [vmem:[#allocation2 + $0xc9] sm:$0xff] %vm2742_vm3, %v2739_v4  ;;  %v2738_v34 = vsel %vm2698_vm9, %v2678_v31, %v2718_v2  ;;  %v2680_v6 = vadd.f32 %v6439_v3, %v7493_v37  ;;  %v5449_v31 = vld [vmem:[%s8100_s3 + $0x18] sm:$0xff] }
 0x236   : > { %2783 = vst.msk [vmem:[#allocation2 + $0xcb] sm:$0x40] %vm2774_vm4, %v2739_v4  ;;  %vm2701_vm10 = vcmp.gt.f32.partialorder %v2681_v5, 0.0  ;;  %v2721_v35 = vmul.f32 0.01, %v2681_v5 }
 0x237   : > { %2759 = vst.msk [vmem:[#allocation2 + $0xc1] sm:$0xff] %vm2742_vm3, %v2738_v34  ;;  %vm2700_vm11 = vcmp.gt.f32.partialorder %v2680_v6, 0.0  ;;  %v2720_v7 = vmul.f32 0.01, %v2680_v6 }
 0x238   : > { %2772 = vst.msk [vmem:[#allocation2 + $0xbf] sm:$0x2] %vm2763_vm6, %v2738_v34  ;;  %v2741_v8 = vsel %vm2701_vm10, %v2681_v5, %v2721_v35 }
 0x239   : > { %2762 = vst.msk [vmem:[#allocation2 + $0xe1] sm:$0xff] %vm2742_vm3, %v2741_v8  ;;  %v2740_v9 = vsel %vm2700_vm11, %v2680_v6, %v2720_v7 }
 0x23a   : > { %2784 = vst.msk [vmem:[#allocation2 + $0xe3] sm:$0x40] %vm2774_vm4, %v2741_v8 }
 0x23b   : > { %2761 = vst.msk [vmem:[#allocation2 + $0xd9] sm:$0xff] %vm2742_vm3, %v2740_v9 }
 0x23c   : > { %2773 = vst.msk [vmem:[#allocation2 + $0xd7] sm:$0x2] %vm2763_vm6, %v2740_v9 }
 0x243   : > { %v2803_v37 = vld [vmem:[%s2800_s28 + $0x10] sm:$0x3]  ;;  %v2801_v11 = vld [vmem:[%s2800_s28] sm:$0xff]  ;;  %v2802_v10 = vld [vmem:[%s2800_s28 + $0x8] sm:$0xff] }
 0x244   : > { %2804 = vst.msk [vmem:[#allocation3] sm:$0xff] %vm2742_vm3, %v2801_v11  ;;  %2805 = vst.msk [vmem:[#allocation3 + $0x8] sm:$0xff] %vm2742_vm3, %v2802_v10  ;;  %v2810_v12 = vld [vmem:[%s7593_s29] sm:$0xff]  ;;  %v2811_v13 = vld [vmem:[%s7593_s29 + $0x8] sm:$0xff] }
 0x245   : > { %2807 = vst.msk [vmem:[#allocation3 + $0x10] sm:$0x3] %vm2806_vm12, %v2803_v37  ;;  %v2812_v14 = vld [vmem:[%s7593_s29 + $0x10] sm:$0x3]  ;;  %v2813_v15 = vld [vmem:[%s7593_s29 + $0x18] sm:$0xff]  ;;  %v2814_v16 = vld [vmem:[%s7593_s29 + $0x20] sm:$0xff] }
 0x246   : > { %2835 = vst.msk [vmem:[#allocation3 + $0x18] sm:$0xff] %vm2742_vm3, %v2810_v12  ;;  %2836 = vst.msk [vmem:[#allocation3 + $0x20] sm:$0xff] %vm2742_vm3, %v2811_v13  ;;  %v2815_v17 = vld [vmem:[%s7593_s29 + $0x28] sm:$0x3]  ;;  %v2816_v18 = vld [vmem:[%s7593_s29 + $0x30] sm:$0xff] }
 0x247   : > { %2837 = vst.msk [vmem:[#allocation3 + $0x28] sm:$0x3] %vm2806_vm12, %v2812_v14  ;;  %2840 = vst.msk [vmem:[#allocation3 + $0x40] sm:$0x3] %vm2806_vm12, %v2815_v17  ;;  %v2817_v19 = vld [vmem:[%s7593_s29 + $0x38] sm:$0xff]  ;;  %v2819_v21 = vld [vmem:[%s7593_s29 + $0x48] sm:$0xff] }
 0x248   : > { %2838 = vst.msk [vmem:[#allocation3 + $0x30] sm:$0xff] %vm2742_vm3, %v2813_v15  ;;  %2839 = vst.msk [vmem:[#allocation3 + $0x38] sm:$0xff] %vm2742_vm3, %v2814_v16  ;;  %v2818_v20 = vld [vmem:[%s7593_s29 + $0x40] sm:$0x3]  ;;  %v2820_v22 = vld [vmem:[%s7593_s29 + $0x50] sm:$0xff] }
 0x249   : > { %2841 = vst.msk [vmem:[#allocation3 + $0x48] sm:$0xff] %vm2742_vm3, %v2816_v18  ;;  %2842 = vst.msk [vmem:[#allocation3 + $0x50] sm:$0xff] %vm2742_vm3, %v2817_v19  ;;  %v2821_v23 = vld [vmem:[%s7593_s29 + $0x58] sm:$0x3]  ;;  %v2822_v24 = vld [vmem:[%s7593_s29 + $0x60] sm:$0xff] }
 0x24a   : > { %2843 = vst.msk [vmem:[#allocation3 + $0x58] sm:$0x3] %vm2806_vm12, %v2818_v20  ;;  %2846 = vst.msk [vmem:[#allocation3 + $0x70] sm:$0x3] %vm2806_vm12, %v2821_v23  ;;  %v2823_v33 = vld [vmem:[%s7593_s29 + $0x68] sm:$0xff]  ;;  %v2825_v39 = vld [vmem:[%s7593_s29 + $0x78] sm:$0xff] }
 0x24b   : > { %2844 = vst.msk [vmem:[#allocation3 + $0x60] sm:$0xff] %vm2742_vm3, %v2819_v21  ;;  %2845 = vst.msk [vmem:[#allocation3 + $0x68] sm:$0xff] %vm2742_vm3, %v2820_v22  ;;  %v2824_v38 = vld [vmem:[%s7593_s29 + $0x70] sm:$0x3]  ;;  %v2826_v40 = vld [vmem:[%s7593_s29 + $0x80] sm:$0xff] }
 0x24c   : > { %2847 = vst.msk [vmem:[#allocation3 + $0x78] sm:$0xff] %vm2742_vm3, %v2822_v24  ;;  %2848 = vst.msk [vmem:[#allocation3 + $0x80] sm:$0xff] %vm2742_vm3, %v2823_v33  ;;  %v2827_v25 = vld [vmem:[%s7593_s29 + $0x88] sm:$0x3]  ;;  %v2828_v26 = vld [vmem:[%s7593_s29 + $0x90] sm:$0xff] }
 0x24d   : > { %2849 = vst.msk [vmem:[#allocation3 + $0x88] sm:$0x3] %vm2806_vm12, %v2824_v38  ;;  %2852 = vst.msk [vmem:[#allocation3 + $0xa0] sm:$0x3] %vm2806_vm12, %v2827_v25  ;;  %v2829_v41 = vld [vmem:[%s7593_s29 + $0x98] sm:$0xff]  ;;  %v7645_v46 = vld [vmem:[#allocation3 + $0x19] sm:$0xff] }
 0x24e   : > { %2850 = vst.msk [vmem:[#allocation3 + $0x90] sm:$0xff] %vm2742_vm3, %v2825_v39  ;;  %2851 = vst.msk [vmem:[#allocation3 + $0x98] sm:$0xff] %vm2742_vm3, %v2826_v40  ;;  %v2830_v42 = vld [vmem:[%s7593_s29 + $0xa0] sm:$0x3]  ;;  %v2885_v43 = vld [vmem:[#allocation3 + $0x1] sm:$0xff] }
 0x24f   : > { %v2886_v44 = vld [vmem:[#allocation3 + $0x9] sm:$0xff]  ;;  %2853 = vst.msk [vmem:[#allocation3 + $0xa8] sm:$0xff] %vm2742_vm3, %v2828_v26  ;;  %2854 = vst.msk [vmem:[#allocation3 + $0xb0] sm:$0xff] %vm2742_vm3, %v2829_v41  ;;  %6188 = vmatprep.mubr.msk.f32.mxu1 %vm2742_vm3, %v2885_v43  ;;  %v7652_v47 = vld [vmem:[#allocation3 + $0x21] sm:$0xff] }
 0x250   : > { %2855 = vst.msk [vmem:[#allocation3 + $0xb8] sm:$0x3] %vm2806_vm12, %v2830_v42  ;;  %6189 = vmatmul.mubr.msk.f32.vlgmr.msra.gmra.mrb[18].mxu1 %vm2742_vm3, %v2886_v44  ;;  %v7656_v48 = vld [vmem:[#allocation3 + $0x31] sm:$0xff]  ;;  %v7665_v27 = vld [vmem:[#allocation3 + $0x49] sm:$0xff]  ;;  %v2832_v52 = vld [vmem:[%s7593_s29 + $0xb0] sm:$0xff] }
 0x251   : > { %6213 = vmatpush3.msra.mxu1 %v7487_v36  ;;  %6191 = vmatprep.mubr.msk.f32.mxu1 %vm2742_vm3, %v7645_v46  ;;  %v7661_v36 = vld [vmem:[#allocation3 + $0x39] sm:$0xff]  ;;  %v7669_v28 = vld [vmem:[#allocation3 + $0x51] sm:$0xff]  ;;  %2857 = vst.msk [vmem:[#allocation3 + $0xc8] sm:$0xff] %vm2742_vm3, %v2832_v52  ;;  %v2833_v53 = vld [vmem:[%s7593_s29 + $0xb8] sm:$0x3] }
 0x252   : > { %6238 = vmatprep.subr.mxu1 %v5432_v45  ;;  %v7673_v49 = vld [vmem:[#allocation3 + $0x61] sm:$0xff]  ;;  %v7677_v50 = vld [vmem:[#allocation3 + $0x69] sm:$0xff]  ;;  %v2831_v51 = vld [vmem:[%s7593_s29 + $0xa8] sm:$0xff]  ;;  %2858 = vst.msk [vmem:[#allocation3 + $0xd0] sm:$0x3] %vm2806_vm12, %v2833_v53 }
 0x253   : > { %2856 = vst.msk [vmem:[#allocation3 + $0xc0] sm:$0xff] %vm2742_vm3, %v2831_v51  ;;  %v2861_v54 = vld [vmem:[%s2860_s10] sm:$0xff]  ;;  %v2862_v55 = vld [vmem:[%s2860_s10 + $0x8] sm:$0xff]  ;;  %v2863_v29 = vld [vmem:[%s2860_s10 + $0x10] sm:$0x3]  ;;  %s5073_s10 = sshll.u32 %s258_s7, 3 }
 0x254   : > { %6192 = vmatmul.mubr.msk.f32.gmra.mrb[20].mxu1 %vm2742_vm3, %v7652_v47  ;;  %v7686_v56 = vld [vmem:[#allocation3 + $0x79] sm:$0xff]  ;;  %2865 = vst.msk [vmem:[#allocation3 + $0xd8] sm:$0xff] %vm2742_vm3, %v2861_v54  ;;  %2866 = vst.msk [vmem:[#allocation3 + $0xe0] sm:$0xff] %vm2742_vm3, %v2862_v55  ;;  %v7694_v30 = vld [vmem:[#allocation3 + $0x81] sm:$0xff]  ;;  %s8034_s18 = scalar_lea.vmem %s8102_s5, %s5073_s10 }
 0x255   : > { %6194 = vmatprep.mubr.msk.f32.mxu1 %vm2742_vm3, %v7656_v48  ;;  %2867 = vst.msk [vmem:[#allocation3 + $0xe8] sm:$0x3] %vm2806_vm12, %v2863_v29  ;;  %v7698_v57 = vld [vmem:[#allocation3 + $0x91] sm:$0xff]  ;;  %v7702_v58 = vld [vmem:[#allocation3 + $0x99] sm:$0xff]  ;;  %v2869_v62 = vld [vmem:[#allocation3 + $0x8] sm:$0xff] }
 0x256   : > { %v7706_v59 = vld [vmem:[#allocation3 + $0xa9] sm:$0xff]  ;;  %v2868_v61 = vld [vmem:[#allocation3] sm:$0xff]  ;;  %v7719_v63 = vld [vmem:[#allocation3 + $0x18] sm:$0xff] }
 0x257   : > { %v7710_v60 = vld [vmem:[#allocation3 + $0xb1] sm:$0xff]  ;;  %v7723_v32 = vld [vmem:[#allocation3 + $0x20] sm:$0xff]  ;;  %v7735_v2 = vld [vmem:[#allocation3 + $0x48] sm:$0xff] }
 0x258   : > { %6195 = vmatmul.mubr.msk.f32.gmra.mrb[22].mxu1 %vm2742_vm3, %v7661_v36  ;;  %v7727_v0 = vld [vmem:[#allocation3 + $0x30] sm:$0xff]  ;;  %v7731_v1 = vld [vmem:[#allocation3 + $0x38] sm:$0xff]  ;;  %v7743_v4 = vld [vmem:[#allocation3 + $0x60] sm:$0xff] }
 0x259   : > { %6197 = vmatprep.mubr.msk.f32.mxu1 %vm2742_vm3, %v7665_v27  ;;  %v7739_v3 = vld [vmem:[#allocation3 + $0x50] sm:$0xff]  ;;  %v7747_v5 = vld [vmem:[#allocation3 + $0x68] sm:$0xff]  ;;  %v7751_v34 = vld [vmem:[#allocation3 + $0x78] sm:$0xff] }
 0x25a   : > { %v7755_v6 = vld [vmem:[#allocation3 + $0x80] sm:$0xff]  ;;  %v7759_v35 = vld [vmem:[#allocation3 + $0x90] sm:$0xff]  ;;  %v7763_v7 = vld [vmem:[#allocation3 + $0x98] sm:$0xff] }
 0x25b   : > { %v7767_v8 = vld [vmem:[#allocation3 + $0xa8] sm:$0xff]  ;;  %v7771_v9 = vld [vmem:[#allocation3 + $0xb0] sm:$0xff]  ;;  %v7780_v12 = vld [vmem:[#allocation3 + $0x1a] sm:$0xff] }
 0x25c   : > { %6198 = vmatmul.mubr.msk.f32.gmra.mrb[24].mxu1 %vm2742_vm3, %v7669_v28  ;;  %v3289_v37 = vld [vmem:[#allocation3 + $0x2] sm:$0xff]  ;;  %v3290_v11 = vld [vmem:[#allocation3 + $0xa] sm:$0xff]  ;;  %v7788_v14 = vld [vmem:[#allocation3 + $0x32] sm:$0xff] }
 0x25d   : > { %6200 = vmatprep.mubr.msk.f32.mxu1 %vm2742_vm3, %v7673_v49  ;;  %v5466_v10 = vld [vmem:[%s8100_s3 + $0x20] sm:$0xff]  ;;  %v7784_v13 = vld [vmem:[#allocation3 + $0x22] sm:$0xff]  ;;  %v7792_v15 = vld [vmem:[#allocation3 + $0x3a] sm:$0xff] }
 0x25e   : > { %v7796_v16 = vld [vmem:[#allocation3 + $0x4a] sm:$0xff]  ;;  %v7800_v17 = vld [vmem:[#allocation3 + $0x52] sm:$0xff]  ;;  %v7804_v18 = vld [vmem:[#allocation3 + $0x62] sm:$0xff] }
 0x25f   : > { %v7808_v19 = vld [vmem:[#allocation3 + $0x6a] sm:$0xff]  ;;  %v7812_v20 = vld [vmem:[#allocation3 + $0x7a] sm:$0xff]  ;;  %v7816_v21 = vld [vmem:[#allocation3 + $0x82] sm:$0xff] }
 0x260   : > { %6201 = vmatmul.mubr.msk.f32.gmra.mrb[26].mxu1 %vm2742_vm3, %v7677_v50  ;;  %v7820_v22 = vld [vmem:[#allocation3 + $0x92] sm:$0xff]  ;;  %v7824_v23 = vld [vmem:[#allocation3 + $0x9a] sm:$0xff]  ;;  %v7828_v24 = vld [vmem:[#allocation3 + $0xaa] sm:$0xff] }
 0x261   : > { %6203 = vmatprep.mubr.msk.f32.mxu1 %vm2742_vm3, %v7686_v56  ;;  %v7832_v33 = vld [vmem:[#allocation3 + $0xb2] sm:$0xff]  ;;  %v3530_v39 = vld [vmem:[#allocation3 + $0xc0] sm:$0xff]  ;;  %v3531_v40 = vld [vmem:[#allocation3 + $0xc8] sm:$0xff] }
 0x262   : > { %v5483_v38 = vld [vmem:[%s8100_s3 + $0x28] sm:$0xff]  ;;  %v5500_v25 = vld [vmem:[%s8100_s3 + $0x30] sm:$0xff]  ;;  %v3758_v41 = vld [vmem:[#allocation3 + $0xc9] sm:$0xff] }
 0x263   : > { %v3757_v26 = vld [vmem:[#allocation3 + $0xc1] sm:$0xff]  ;;  %v3985_v44 = vld [vmem:[#allocation3 + $0xca] sm:$0xff] }
 0x264   : > { %6204 = vmatmul.mubr.msk.f32.gmra.mrb[28].mxu1 %vm2742_vm3, %v7694_v30  ;;  %v5517_v42 = vld [vmem:[%s8100_s3 + $0x38] sm:$0xff] }
 0x265   : > { %6206 = vmatprep.mubr.msk.f32.mxu1 %vm2742_vm3, %v7698_v57  ;;  %v3984_v43 = vld [vmem:[#allocation3 + $0xc2] sm:$0xff] }
 0x268   : > { %6207 = vmatmul.mubr.msk.f32.gmra.mrb[30].mxu1 %vm2742_vm3, %v7702_v58 }
 0x269   : > { %6209 = vmatprep.mubr.msk.f32.mxu1 %vm2742_vm3, %v7706_v59 }
 0x26c   : > { %6210 = vmatmul.mubr.msk.f32.gmra.mrb[32].mxu1 %vm2742_vm3, %v7710_v60 }
 0x26d   : > { %6214 = vmatprep.mubr.msk.f32.mxu1 %vm2742_vm3, %v2868_v61 }
 0x270   : > { %6215 = vmatmul.mubr.msk.f32.vlgmr.msra.gmra.mrb[18].mxu1 %vm2742_vm3, %v2869_v62 }
 0x271   : > { %6239 = vmatpush3.msra.mxu1 %v5432_v45  ;;  %6217 = vmatprep.mubr.msk.f32.mxu1 %vm2742_vm3, %v7719_v63  ;;  %v5534_v45 = vld [vmem:[%s8100_s3 + $0x40] sm:$0xff] }
 0x272   : > { %6264 = vmatprep.subr.mxu1 %v5449_v31 }
 0x274   : > { %6218 = vmatmul.mubr.msk.f32.gmra.mrb[20].mxu1 %vm2742_vm3, %v7723_v32 }
 0x275   : > { %6220 = vmatprep.mubr.msk.f32.mxu1 %vm2742_vm3, %v7727_v0 }
 0x278   : > { %6221 = vmatmul.mubr.msk.f32.gmra.mrb[22].mxu1 %vm2742_vm3, %v7731_v1 }
 0x279   : > { %6223 = vmatprep.mubr.msk.f32.mxu1 %vm2742_vm3, %v7735_v2 }
 0x27c   : > { %6224 = vmatmul.mubr.msk.f32.gmra.mrb[24].mxu1 %vm2742_vm3, %v7739_v3 }
 0x27d   : > { %6226 = vmatprep.mubr.msk.f32.mxu1 %vm2742_vm3, %v7743_v4 }
 0x280   : > { %6227 = vmatmul.mubr.msk.f32.gmra.mrb[26].mxu1 %vm2742_vm3, %v7747_v5 }
 0x281   : > { %6229 = vmatprep.mubr.msk.f32.mxu1 %vm2742_vm3, %v7751_v34 }
 0x284   : > { %6230 = vmatmul.mubr.msk.f32.gmra.mrb[28].mxu1 %vm2742_vm3, %v7755_v6 }
 0x285   : > { %6232 = vmatprep.mubr.msk.f32.mxu1 %vm2742_vm3, %v7759_v35 }
 0x288   : > { %6233 = vmatmul.mubr.msk.f32.gmra.mrb[30].mxu1 %vm2742_vm3, %v7763_v7 }
 0x289   : > { %6235 = vmatprep.mubr.msk.f32.mxu1 %vm2742_vm3, %v7767_v8 }
 0x28c   : > { %6236 = vmatmul.mubr.msk.f32.gmra.mrb[32].mxu1 %vm2742_vm3, %v7771_v9 }
 0x28d   : > { %6240 = vmatprep.mubr.msk.f32.mxu1 %vm2742_vm3, %v3289_v37 }
 0x290   : > { %6241 = vmatmul.mubr.msk.f32.vlgmr.msra.gmra.mrb[18].mxu1 %vm2742_vm3, %v3290_v11 }
 0x291   : > { %6265 = vmatpush3.msra.mxu1 %v5449_v31  ;;  %6243 = vmatprep.mubr.msk.f32.mxu1 %vm2742_vm3, %v7780_v12 }
 0x292   : > { %6290 = vmatprep.subr.mxu1 %v5466_v10 }
 0x294   : > { %6244 = vmatmul.mubr.msk.f32.gmra.mrb[20].mxu1 %vm2742_vm3, %v7784_v13 }
 0x295   : > { %6246 = vmatprep.mubr.msk.f32.mxu1 %vm2742_vm3, %v7788_v14 }
 0x298   : > { %6247 = vmatmul.mubr.msk.f32.gmra.mrb[22].mxu1 %vm2742_vm3, %v7792_v15 }
 0x299   : > { %6249 = vmatprep.mubr.msk.f32.mxu1 %vm2742_vm3, %v7796_v16 }
 0x29c   : > { %6250 = vmatmul.mubr.msk.f32.gmra.mrb[24].mxu1 %vm2742_vm3, %v7800_v17 }
 0x29d   : > { %6252 = vmatprep.mubr.msk.f32.mxu1 %vm2742_vm3, %v7804_v18 }
 0x2a0   : > { %6253 = vmatmul.mubr.msk.f32.gmra.mrb[26].mxu1 %vm2742_vm3, %v7808_v19 }
 0x2a1   : > { %6255 = vmatprep.mubr.msk.f32.mxu1 %vm2742_vm3, %v7812_v20 }
 0x2a4   : > { %6256 = vmatmul.mubr.msk.f32.gmra.mrb[28].mxu1 %vm2742_vm3, %v7816_v21 }
 0x2a5   : > { %6258 = vmatprep.mubr.msk.f32.mxu1 %vm2742_vm3, %v7820_v22 }
 0x2a8   : > { %6259 = vmatmul.mubr.msk.f32.gmra.mrb[30].mxu1 %vm2742_vm3, %v7824_v23 }
 0x2a9   : > { %6261 = vmatprep.mubr.msk.f32.mxu1 %vm2742_vm3, %v7828_v24 }
 0x2ac   : > { %6262 = vmatmul.mubr.msk.f32.gmra.mrb[32].mxu1 %vm2742_vm3, %v7832_v33 }
 0x2ad   : > { %6266 = vmatprep.mubr.msk.f32.mxu1 %vm2742_vm3, %v7719_v63 }
 0x2b0   : > { %6267 = vmatmul.mubr.msk.f32.vlgmr.msra.gmra.mrb[18].mxu1 %vm2742_vm3, %v7723_v32 }
 0x2b1   : > { %6291 = vmatpush3.msra.mxu1 %v5466_v10  ;;  %6269 = vmatprep.mubr.msk.f32.mxu1 %vm2742_vm3, %v7727_v0 }
 0x2b2   : > { %6316 = vmatprep.subr.mxu1 %v5483_v38 }
 0x2b4   : > { %6270 = vmatmul.mubr.msk.f32.gmra.mrb[20].mxu1 %vm2742_vm3, %v7731_v1 }
 0x2b5   : > { %6272 = vmatprep.mubr.msk.f32.mxu1 %vm2742_vm3, %v7735_v2 }
 0x2b8   : > { %6273 = vmatmul.mubr.msk.f32.gmra.mrb[22].mxu1 %vm2742_vm3, %v7739_v3 }
 0x2b9   : > { %6275 = vmatprep.mubr.msk.f32.mxu1 %vm2742_vm3, %v7743_v4 }
 0x2bc   : > { %6276 = vmatmul.mubr.msk.f32.gmra.mrb[24].mxu1 %vm2742_vm3, %v7747_v5 }
 0x2bd   : > { %6278 = vmatprep.mubr.msk.f32.mxu1 %vm2742_vm3, %v7751_v34 }
 0x2c0   : > { %6279 = vmatmul.mubr.msk.f32.gmra.mrb[26].mxu1 %vm2742_vm3, %v7755_v6 }
 0x2c1   : > { %6281 = vmatprep.mubr.msk.f32.mxu1 %vm2742_vm3, %v7759_v35 }
 0x2c4   : > { %6282 = vmatmul.mubr.msk.f32.gmra.mrb[28].mxu1 %vm2742_vm3, %v7763_v7 }
 0x2c5   : > { %6284 = vmatprep.mubr.msk.f32.mxu1 %vm2742_vm3, %v7767_v8 }
 0x2c8   : > { %6285 = vmatmul.mubr.msk.f32.gmra.mrb[30].mxu1 %vm2742_vm3, %v7771_v9 }
 0x2c9   : > { %6287 = vmatprep.mubr.msk.f32.mxu1 %vm2742_vm3, %v3530_v39 }
 0x2cc   : > { %6288 = vmatmul.mubr.msk.f32.gmra.mrb[32].mxu1 %vm2742_vm3, %v3531_v40 }
 0x2cd   : > { %6292 = vmatprep.mubr.msk.f32.mxu1 %vm2742_vm3, %v7645_v46  ;;  %v4212_v46 = vld [vmem:[#allocation3 + $0xd8] sm:$0xff] }
 0x2d0   : > { %6293 = vmatmul.mubr.msk.f32.vlgmr.msra.gmra.mrb[18].mxu1 %vm2742_vm3, %v7652_v47  ;;  %v4213_v47 = vld [vmem:[#allocation3 + $0xe0] sm:$0xff] }
 0x2d1   : > { %6317 = vmatpush3.msra.mxu1 %v5483_v38  ;;  %6295 = vmatprep.mubr.msk.f32.mxu1 %vm2742_vm3, %v7656_v48 }
 0x2d2   : > { %6342 = vmatprep.subr.mxu1 %v5500_v25 }
 0x2d4   : > { %6296 = vmatmul.mubr.msk.f32.gmra.mrb[20].mxu1 %vm2742_vm3, %v7661_v36 }
 0x2d5   : > { %6298 = vmatprep.mubr.msk.f32.mxu1 %vm2742_vm3, %v7665_v27 }
 0x2d8   : > { %6299 = vmatmul.mubr.msk.f32.gmra.mrb[22].mxu1 %vm2742_vm3, %v7669_v28 }
 0x2d9   : > { %6301 = vmatprep.mubr.msk.f32.mxu1 %vm2742_vm3, %v7673_v49 }
 0x2dc   : > { %6302 = vmatmul.mubr.msk.f32.gmra.mrb[24].mxu1 %vm2742_vm3, %v7677_v50 }
 0x2dd   : > { %6304 = vmatprep.mubr.msk.f32.mxu1 %vm2742_vm3, %v7686_v56 }
 0x2e0   : > { %6305 = vmatmul.mubr.msk.f32.gmra.mrb[26].mxu1 %vm2742_vm3, %v7694_v30 }
 0x2e1   : > { %6307 = vmatprep.mubr.msk.f32.mxu1 %vm2742_vm3, %v7698_v57 }
 0x2e4   : > { %6308 = vmatmul.mubr.msk.f32.gmra.mrb[28].mxu1 %vm2742_vm3, %v7702_v58 }
 0x2e5   : > { %6310 = vmatprep.mubr.msk.f32.mxu1 %vm2742_vm3, %v7706_v59 }
 0x2e8   : > { %6311 = vmatmul.mubr.msk.f32.gmra.mrb[30].mxu1 %vm2742_vm3, %v7710_v60 }
 0x2e9   : > { %6313 = vmatprep.mubr.msk.f32.mxu1 %vm2742_vm3, %v3757_v26 }
 0x2ec   : > { %6314 = vmatmul.mubr.msk.f32.gmra.mrb[32].mxu1 %vm2742_vm3, %v3758_v41 }
 0x2ed   : > { %6318 = vmatprep.mubr.msk.f32.mxu1 %vm2742_vm3, %v7780_v12 }
 0x2f0   : > { %6319 = vmatmul.mubr.msk.f32.vlgmr.msra.gmra.mrb[18].mxu1 %vm2742_vm3, %v7784_v13 }
 0x2f1   : > { %6343 = vmatpush3.msra.mxu1 %v5500_v25  ;;  %6321 = vmatprep.mubr.msk.f32.mxu1 %vm2742_vm3, %v7788_v14 }
 0x2f2   : > { %6368 = vmatprep.subr.mxu1 %v5517_v42 }
 0x2f4   : > { %6322 = vmatmul.mubr.msk.f32.gmra.mrb[20].mxu1 %vm2742_vm3, %v7792_v15 }
 0x2f5   : > { %6324 = vmatprep.mubr.msk.f32.mxu1 %vm2742_vm3, %v7796_v16 }
 0x2f8   : > { %6325 = vmatmul.mubr.msk.f32.gmra.mrb[22].mxu1 %vm2742_vm3, %v7800_v17 }
 0x2f9   : > { %6327 = vmatprep.mubr.msk.f32.mxu1 %vm2742_vm3, %v7804_v18 }
 0x2fc   : > { %6328 = vmatmul.mubr.msk.f32.gmra.mrb[24].mxu1 %vm2742_vm3, %v7808_v19 }
 0x2fd   : > { %6330 = vmatprep.mubr.msk.f32.mxu1 %vm2742_vm3, %v7812_v20 }
 0x300   : > { %6331 = vmatmul.mubr.msk.f32.gmra.mrb[26].mxu1 %vm2742_vm3, %v7816_v21 }
 0x301   : > { %6333 = vmatprep.mubr.msk.f32.mxu1 %vm2742_vm3, %v7820_v22 }
 0x304   : > { %6334 = vmatmul.mubr.msk.f32.gmra.mrb[28].mxu1 %vm2742_vm3, %v7824_v23 }
 0x305   : > { %6336 = vmatprep.mubr.msk.f32.mxu1 %vm2742_vm3, %v7828_v24 }
 0x308   : > { %6337 = vmatmul.mubr.msk.f32.gmra.mrb[30].mxu1 %vm2742_vm3, %v7832_v33 }
 0x309   : > { %6339 = vmatprep.mubr.msk.f32.mxu1 %vm2742_vm3, %v3984_v43 }
 0x30c   : > { %6340 = vmatmul.mubr.msk.f32.gmra.mrb[32].mxu1 %vm2742_vm3, %v3985_v44 }
 0x30d   : > { %6344 = vmatprep.mubr.msk.f32.mxu1 %vm2742_vm3, %v7727_v0 }
 0x310   : > { %6345 = vmatmul.mubr.msk.f32.vlgmr.msra.gmra.mrb[18].mxu1 %vm2742_vm3, %v7731_v1 }
 0x311   : > { %6369 = vmatpush3.msra.mxu1 %v5517_v42  ;;  %6347 = vmatprep.mubr.msk.f32.mxu1 %vm2742_vm3, %v7735_v2 }
 0x312   : > { %6394 = vmatprep.subr.mxu1 %v5534_v45 }
 0x314   : > { %6348 = vmatmul.mubr.msk.f32.gmra.mrb[20].mxu1 %vm2742_vm3, %v7739_v3 }
 0x315   : > { %6350 = vmatprep.mubr.msk.f32.mxu1 %vm2742_vm3, %v7743_v4 }
 0x318   : > { %6351 = vmatmul.mubr.msk.f32.gmra.mrb[22].mxu1 %vm2742_vm3, %v7747_v5 }
 0x319   : > { %6353 = vmatprep.mubr.msk.f32.mxu1 %vm2742_vm3, %v7751_v34 }
 0x31c   : > { %6354 = vmatmul.mubr.msk.f32.gmra.mrb[24].mxu1 %vm2742_vm3, %v7755_v6 }
 0x31d   : > { %6356 = vmatprep.mubr.msk.f32.mxu1 %vm2742_vm3, %v7759_v35 }
 0x320   : > { %6357 = vmatmul.mubr.msk.f32.gmra.mrb[26].mxu1 %vm2742_vm3, %v7763_v7 }
 0x321   : > { %6359 = vmatprep.mubr.msk.f32.mxu1 %vm2742_vm3, %v7767_v8 }
 0x324   : > { %6360 = vmatmul.mubr.msk.f32.gmra.mrb[28].mxu1 %vm2742_vm3, %v7771_v9 }
 0x325   : > { %6362 = vmatprep.mubr.msk.f32.mxu1 %vm2742_vm3, %v3530_v39 }
 0x328   : > { %6363 = vmatmul.mubr.msk.f32.gmra.mrb[30].mxu1 %vm2742_vm3, %v3531_v40 }
 0x329   : > { %6365 = vmatprep.mubr.msk.f32.mxu1 %vm2742_vm3, %v4212_v46 }
 0x32c   : > { %6366 = vmatmul.mubr.msk.f32.gmra.mrb[32].mxu1 %vm2742_vm3, %v4213_v47 }
 0x32d   : > { %6370 = vmatprep.mubr.msk.f32.mxu1 %vm2742_vm3, %v7656_v48  ;;  %v4439_v48 = vld [vmem:[#allocation3 + $0xd9] sm:$0xff] }
 0x330   : > { %6371 = vmatmul.mubr.msk.f32.vlgmr.msra.gmra.mrb[18].mxu1 %vm2742_vm3, %v7661_v36  ;;  %v4440_v36 = vld [vmem:[#allocation3 + $0xe1] sm:$0xff] }
 0x331   : > { %6395 = vmatpush3.msra.mxu1 %v5534_v45  ;;  %6373 = vmatprep.mubr.msk.f32.mxu1 %vm2742_vm3, %v7665_v27  ;;  %v4666_v27 = vld [vmem:[#allocation3 + $0xda] sm:$0xff] }
 0x334   : > { %6374 = vmatmul.mubr.msk.f32.gmra.mrb[20].mxu1 %vm2742_vm3, %v7669_v28  ;;  %v4667_v28 = vld [vmem:[#allocation3 + $0xe2] sm:$0xff] }
 0x335   : > { %6376 = vmatprep.mubr.msk.f32.mxu1 %vm2742_vm3, %v7673_v49  ;;  %v8027_v49 = vld [vmem:[%s8101_s4] ss:$0 sm:$0xff] }
 0x338   : > { %6377 = vmatmul.mubr.msk.f32.gmra.mrb[22].mxu1 %vm2742_vm3, %v7677_v50 }
 0x339   : > { %6379 = vmatprep.mubr.msk.f32.mxu1 %vm2742_vm3, %v7686_v56 }
 0x33c   : > { %6380 = vmatmul.mubr.msk.f32.gmra.mrb[24].mxu1 %vm2742_vm3, %v7694_v30 }
 0x33d   : > { %6382 = vmatprep.mubr.msk.f32.mxu1 %vm2742_vm3, %v7698_v57 }
 0x340   : > { %6383 = vmatmul.mubr.msk.f32.gmra.mrb[26].mxu1 %vm2742_vm3, %v7702_v58 }
 0x341   : > { %6385 = vmatprep.mubr.msk.f32.mxu1 %vm2742_vm3, %v7706_v59 }
 0x344   : > { %6386 = vmatmul.mubr.msk.f32.gmra.mrb[28].mxu1 %vm2742_vm3, %v7710_v60 }
 0x345   : > { %6388 = vmatprep.mubr.msk.f32.mxu1 %vm2742_vm3, %v3757_v26 }
 0x348   : > { %6389 = vmatmul.mubr.msk.f32.gmra.mrb[30].mxu1 %vm2742_vm3, %v3758_v41 }
 0x349   : > { %6391 = vmatprep.mubr.msk.f32.mxu1 %vm2742_vm3, %v4439_v48 }
 0x34c   : > { %6392 = vmatmul.mubr.msk.f32.gmra.mrb[32].mxu1 %vm2742_vm3, %v4440_v36 }
 0x34d   : > { %6396 = vmatprep.mubr.msk.f32.mxu1 %vm2742_vm3, %v7788_v14 }
 0x350   : > { %6397 = vmatmul.mubr.msk.f32.vlgmr.msra.gmra.mrb[18].mxu1 %vm2742_vm3, %v7792_v15 }
 0x351   : > { %6399 = vmatprep.mubr.msk.f32.mxu1 %vm2742_vm3, %v7796_v16 }
 0x354   : > { %6400 = vmatmul.mubr.msk.f32.gmra.mrb[20].mxu1 %vm2742_vm3, %v7800_v17 }
 0x355   : > { %6402 = vmatprep.mubr.msk.f32.mxu1 %vm2742_vm3, %v7804_v18 }
 0x358   : > { %6403 = vmatmul.mubr.msk.f32.gmra.mrb[22].mxu1 %vm2742_vm3, %v7808_v19 }
 0x359   : > { %6405 = vmatprep.mubr.msk.f32.mxu1 %vm2742_vm3, %v7812_v20 }
 0x35c   : > { %6406 = vmatmul.mubr.msk.f32.gmra.mrb[24].mxu1 %vm2742_vm3, %v7816_v21 }
 0x35d   : > { %6408 = vmatprep.mubr.msk.f32.mxu1 %vm2742_vm3, %v7820_v22 }
 0x360   : > { %6409 = vmatmul.mubr.msk.f32.gmra.mrb[26].mxu1 %vm2742_vm3, %v7824_v23 }
 0x361   : > { %6411 = vmatprep.mubr.msk.f32.mxu1 %vm2742_vm3, %v7828_v24 }
 0x364   : > { %6412 = vmatmul.mubr.msk.f32.gmra.mrb[28].mxu1 %vm2742_vm3, %v7832_v33 }
 0x365   : > { %6414 = vmatprep.mubr.msk.f32.mxu1 %vm2742_vm3, %v3984_v43 }
 0x368   : > { %6415 = vmatmul.mubr.msk.f32.gmra.mrb[30].mxu1 %vm2742_vm3, %v3985_v44 }
 0x369   : > { %6417 = vmatprep.mubr.msk.f32.mxu1 %vm2742_vm3, %v4666_v27 }
 0x36c   : > { %6418 = vmatmul.mubr.msk.f32.gmra.mrb[32].mxu1 %vm2742_vm3, %v4667_v28 }
 0x423   : > { %v6398_v50 = vpop.f32.mrb[18].mxu1 }
 0x424   : > { %v4887_v51 = vadd.f32 %v6398_v50, %v8027_v49  ;;  %v4784_v52 = vpop.f32.mrb[19].mxu1 }
 0x425   : > { %v4886_v53 = vadd.f32 %v8027_v49, %v4784_v52 }
 0x426   : > { %vm4903_vm4 = vcmp.gt.f32.partialorder %v4887_v51, 0.0  ;;  %v4919_v54 = vmul.f32 0.01, %v4887_v51 }
 0x427   : > { %vm4902_vm6 = vcmp.gt.f32.partialorder %v4886_v53, 0.0  ;;  %v4918_v55 = vmul.f32 0.01, %v4886_v53  ;;  %v6401_v56 = vpop.f32.mrb[20].mxu1 }
 0x428   : > { %v4935_v29 = vsel %vm4903_vm4, %v4887_v51, %v4919_v54  ;;  %v4889_v30 = vadd.f32 %v6401_v56, %v8027_v49  ;;  %v4794_v57 = vpop.f32.mrb[21].mxu1 }
 0x429   : > { %4951 = vst.msk [vmem:[%s8034_s18 + $0x8] sm:$0xff] %vm2742_vm3, %v4935_v29  ;;  %v4934_v58 = vsel %vm4902_vm6, %v4886_v53, %v4918_v55  ;;  %v4888_v59 = vadd.f32 %v8027_v49, %v4794_v57 }
 0x42a   : > { %4950 = vst.msk [vmem:[%s8034_s18] sm:$0xff] %vm2742_vm3, %v4934_v58  ;;  %vm4905_vm13 = vcmp.gt.f32.partialorder %v4889_v30, 0.0  ;;  %v4921_v60 = vmul.f32 0.01, %v4889_v30 }
 0x42b   : > { %vm4904_vm14 = vcmp.gt.f32.partialorder %v4888_v59, 0.0  ;;  %v4920_v61 = vmul.f32 0.01, %v4888_v59  ;;  %v6404_v62 = vpop.f32.mrb[22].mxu1 }
 0x42c   : > { %v4937_v31 = vsel %vm4905_vm13, %v4889_v30, %v4921_v60  ;;  %v4891_v63 = vadd.f32 %v6404_v62, %v8027_v49  ;;  %v4804_v32 = vpop.f32.mrb[23].mxu1 }
 0x42d   : > { %4953 = vst.msk [vmem:[%s8034_s18 + $0x18] sm:$0xff] %vm2742_vm3, %v4937_v31  ;;  %v4936_v0 = vsel %vm4904_vm14, %v4888_v59, %v4920_v61  ;;  %v4890_v1 = vadd.f32 %v8027_v49, %v4804_v32 }
 0x42e   : > { %4952 = vst.msk [vmem:[%s8034_s18 + $0x10] sm:$0xff] %vm2742_vm3, %v4936_v0  ;;  %vm4907_vm15 = vcmp.gt.f32.partialorder %v4891_v63, 0.0  ;;  %v4923_v2 = vmul.f32 0.01, %v4891_v63 }
 0x42f   : > { %vm4906_vm0 = vcmp.gt.f32.partialorder %v4890_v1, 0.0  ;;  %v4922_v3 = vmul.f32 0.01, %v4890_v1  ;;  %v6407_v4 = vpop.f32.mrb[24].mxu1 }
 0x430   : > { %v4939_v5 = vsel %vm4907_vm15, %v4891_v63, %v4923_v2  ;;  %v4893_v34 = vadd.f32 %v6407_v4, %v8027_v49  ;;  %v4814_v6 = vpop.f32.mrb[25].mxu1 }
 0x431   : > { %4955 = vst.msk [vmem:[%s8034_s18 + $0x28] sm:$0xff] %vm2742_vm3, %v4939_v5  ;;  %v4938_v35 = vsel %vm4906_vm0, %v4890_v1, %v4922_v3  ;;  %v4892_v7 = vadd.f32 %v8027_v49, %v4814_v6 }
 0x432   : > { %4954 = vst.msk [vmem:[%s8034_s18 + $0x20] sm:$0xff] %vm2742_vm3, %v4938_v35  ;;  %vm4909_vm1 = vcmp.gt.f32.partialorder %v4893_v34, 0.0  ;;  %v4925_v8 = vmul.f32 0.01, %v4893_v34 }
 0x433   : > { %vm4908_vm2 = vcmp.gt.f32.partialorder %v4892_v7, 0.0  ;;  %v4924_v9 = vmul.f32 0.01, %v4892_v7  ;;  %v6410_v37 = vpop.f32.mrb[26].mxu1 }
 0x434   : > { %v4941_v11 = vsel %vm4909_vm1, %v4893_v34, %v4925_v8  ;;  %v4895_v10 = vadd.f32 %v6410_v37, %v8027_v49  ;;  %v4824_v12 = vpop.f32.mrb[27].mxu1 }
 0x435   : > { %4957 = vst.msk [vmem:[%s8034_s18 + $0x38] sm:$0xff] %vm2742_vm3, %v4941_v11  ;;  %v4940_v13 = vsel %vm4908_vm2, %v4892_v7, %v4924_v9  ;;  %v4894_v14 = vadd.f32 %v8027_v49, %v4824_v12 }
 0x436   : > { %4956 = vst.msk [vmem:[%s8034_s18 + $0x30] sm:$0xff] %vm2742_vm3, %v4940_v13  ;;  %vm4911_vm5 = vcmp.gt.f32.partialorder %v4895_v10, 0.0  ;;  %v4927_v15 = vmul.f32 0.01, %v4895_v10 }
 0x437   : > { %vm4910_vm7 = vcmp.gt.f32.partialorder %v4894_v14, 0.0  ;;  %v4926_v16 = vmul.f32 0.01, %v4894_v14  ;;  %v6413_v17 = vpop.f32.mrb[28].mxu1 }
 0x438   : > { %v4943_v18 = vsel %vm4911_vm5, %v4895_v10, %v4927_v15  ;;  %v4897_v19 = vadd.f32 %v6413_v17, %v8027_v49  ;;  %v4834_v20 = vpop.f32.mrb[29].mxu1 }
 0x439   : > { %4959 = vst.msk [vmem:[%s8034_s18 + $0x48] sm:$0xff] %vm2742_vm3, %v4943_v18  ;;  %v4942_v21 = vsel %vm4910_vm7, %v4894_v14, %v4926_v16  ;;  %v4896_v22 = vadd.f32 %v8027_v49, %v4834_v20 }
 0x43a   : > { %4958 = vst.msk [vmem:[%s8034_s18 + $0x40] sm:$0xff] %vm2742_vm3, %v4942_v21  ;;  %vm4913_vm8 = vcmp.gt.f32.partialorder %v4897_v19, 0.0  ;;  %v4929_v23 = vmul.f32 0.01, %v4897_v19 }
 0x43b   : > { %vm4912_vm9 = vcmp.gt.f32.partialorder %v4896_v22, 0.0  ;;  %v4928_v24 = vmul.f32 0.01, %v4896_v22  ;;  %v6416_v33 = vpop.f32.mrb[30].mxu1 }
 0x43c   : > { %v4945_v38 = vsel %vm4913_vm8, %v4897_v19, %v4929_v23  ;;  %v4899_v39 = vadd.f32 %v6416_v33, %v8027_v49  ;;  %v4844_v40 = vpop.f32.mrb[31].mxu1 }
 0x43d   : > { %4961 = vst.msk [vmem:[%s8034_s18 + $0x58] sm:$0xff] %vm2742_vm3, %v4945_v38  ;;  %v4944_v25 = vsel %vm4912_vm9, %v4896_v22, %v4928_v24  ;;  %v4898_v26 = vadd.f32 %v8027_v49, %v4844_v40 }
 0x43e   : > { %4960 = vst.msk [vmem:[%s8034_s18 + $0x50] sm:$0xff] %vm2742_vm3, %v4944_v25  ;;  %vm4915_vm10 = vcmp.gt.f32.partialorder %v4899_v39, 0.0  ;;  %v4931_v41 = vmul.f32 0.01, %v4899_v39 }
 0x43f   : > { %vm4914_vm11 = vcmp.gt.f32.partialorder %v4898_v26, 0.0  ;;  %v4930_v42 = vmul.f32 0.01, %v4898_v26  ;;  %v6419_v43 = vpop.f32.mrb[32].mxu1 }
 0x440   : > { %v4947_v44 = vsel %vm4915_vm10, %v4899_v39, %v4931_v41  ;;  %v4901_v45 = vadd.f32 %v6419_v43, %v8027_v49  ;;  %v4854_v46 = vpop.f32.mrb[33].mxu1 }
 0x441   : > { %4963 = vst.msk [vmem:[%s8034_s18 + $0x68] sm:$0xff] %vm2742_vm3, %v4947_v44  ;;  %v4946_v47 = vsel %vm4914_vm11, %v4898_v26, %v4930_v42  ;;  %v4900_v48 = vadd.f32 %v8027_v49, %v4854_v46 }
 0x442   : > { %4962 = vst.msk [vmem:[%s8034_s18 + $0x60] sm:$0xff] %vm2742_vm3, %v4946_v47  ;;  %vm4917_vm12 = vcmp.gt.f32.partialorder %v4901_v45, 0.0  ;;  %v4933_v36 = vmul.f32 0.01, %v4901_v45 }
 0x443   : > { %vm4916_vm4 = vcmp.gt.f32.partialorder %v4900_v48, 0.0  ;;  %v4932_v27 = vmul.f32 0.01, %v4900_v48 }
 0x444   : > { %v4949_v28 = vsel %vm4917_vm12, %v4901_v45, %v4933_v36 }
 0x445   : > { %4965 = vst.msk [vmem:[%s8034_s18 + $0x78] sm:$0xff] %vm2742_vm3, %v4949_v28  ;;  %v4948_v50 = vsel %vm4916_vm4, %v4900_v48, %v4932_v27 }
 0x446   : > { %4964 = vst.msk [vmem:[%s8034_s18 + $0x70] sm:$0xff] %vm2742_vm3, %v4948_v50 }
 0x447 PF: > { %s15_s22 = sadd.s32 1, %s6790_s22   ;;  %s8103_s18 = smov %s6782_s20 }
 0x448   : > { %p12_p12 = scmp.ge.s32.totalorder %s15_s22, 6   ;;  %s8104_s19 = smov %s6786_s21 }
 0x449   : > { %s8105_s20 = smov %s8108_s23  ;;  %s8106_s21 = smov %s8112_s24 }
 0x44a   :  { %14 = sbr.rel (!%p12_p12) target bundleno = 3 (0x3), region = 94 }

</bundles_post_ra>
